<compile_context>
chip_gen: v5e
topology: v5e:2x2
jax: 0.10.0
libtpu: 0.0.40
codegen_flags: <defaults>
</compile_context>

<pallas_src>
import functools

import jax
import jax.numpy as jnp
from jax.experimental import pallas as pl
from jax.experimental.pallas import tpu as pltpu

EPS = 1e-5                                  # nn.GroupNorm default eps
MM_PRECISION = jax.lax.Precision.HIGHEST    # keep f32 MXU passes (tight ref check)
PAD = 128                                   # lane-aligned zero pad of the flat spatial axis


def _gn1(v, gamma, beta):
  """GroupNorm(1, C) over a whole (C, HW) per-sample tile, one-pass stats."""
  inv_n = 1.0 / float(v.shape[0] * v.shape[1])
  row_s = jnp.sum(v, axis=1, keepdims=True)            # (C, 1)  lane reduce
  row_ss = jnp.sum(v * v, axis=1, keepdims=True)       # (C, 1)
  mean = jnp.sum(row_s, axis=0, keepdims=True) * inv_n     # (1, 1)
  ex2 = jnp.sum(row_ss, axis=0, keepdims=True) * inv_n     # (1, 1)
  var = jnp.maximum(ex2 - mean * mean, 0.0)
  return (v - mean) * jax.lax.rsqrt(var + EPS) * gamma + beta


def _ghost_ffn_kernel(x_ref, mask_ref, pww_ref, pwgn_ref, dww_ref, dwgn_ref,
                      fcw_ref, fcb_ref, o_ref, pad_ref, *, W, paths):
  """Entire GhostFFN for one batch sample; activations in (C, H*W) layout."""
  C = x_ref.shape[1]
  HW = x_ref.shape[2]

  x = x_ref[...][0]                       # (C, HW)     H*W on the lane axis
  masks = mask_ref[...]                   # (2, HW)     column-wrap validity
  pww = pww_ref[...]                      # (C, C)
  pwgn = pwgn_ref[...]                    # (C, 2)      [gamma | beta]
  dww = dww_ref[...]                      # (C, 9*nblk)
  dwgn = dwgn_ref[...]                    # (C, 2*nblk)
  fcw = fcw_ref[...]                      # (C, paths*C)
  fcb = fcb_ref[...]                      # (C, 1)

  left_ok = masks[0:1, :] > 0.5           # valid source for taps with kw == 0
  right_ok = masks[1:2, :] > 0.5          # valid source for taps with kw == 2

  # --- pw_conv: 1x1 conv (no bias) + GroupNorm(1, C); (C,C)@(C,HW) on the MXU.
  y = jnp.dot(pww, x, precision=MM_PRECISION, preferred_element_type=jnp.float32)
  y = _gn1(y, pwgn[:, 0:1], pwgn[:, 1:2])

  # Zero the padded row buffer once per sample; only its middle is rewritten
  # per depthwise block, so the two PAD-wide borders stay zero.
  pad_ref[...] = jnp.zeros_like(pad_ref)

  def dw_block(z, blk):
    """Depthwise 3x3 (stride 1, pad 1, no bias) + GroupNorm(1, C)."""
    # In the flattened (C, HW) layout a (kh, kw) tap is a shift of
    # (kh-1)*W + (kw-1) along the lane axis.  Writing z into a zero-padded
    # VMEM row buffer turns every tap into a plain static slice (no host pad,
    # no strided loads); only the column wrap (kw = 0 / 2) needs masking.
    pad_ref[:, PAD:PAD + HW] = z
    acc = jnp.zeros((C, HW), jnp.float32)
    for kh in range(3):
      for kw in range(3):
        off = PAD + (kh - 1) * W + (kw - 1)
        tap = pad_ref[:, off:off + HW]
        if kw == 0:
          tap = jnp.where(left_ok, tap, 0.0)
        elif kw == 2:
          tap = jnp.where(right_ok, tap, 0.0)
        col = 9 * blk + 3 * kh + kw
        acc = acc + tap * dww[:, col:col + 1]            # per-channel weight
    return _gn1(acc, dwgn[:, 2 * blk:2 * blk + 1], dwgn[:, 2 * blk + 1:2 * blk + 2])

  # --- ghost paths: path p applies (p+1) chained depthwise blocks to y -------
  # TODO(synk): at real MPViT sizes (H*W up to 56*56, C up to ~288) chunk the
  # depthwise pass over spatial tiles (two-pass GN) to bound vreg/VMEM
  # pressure; whole-image per-sample tiles fit v7x's 64 MiB VMEM here easily.
  blk = 0
  branch_outs = []
  for p in range(paths):
    z = y
    for _ in range(p + 1):
      z = dw_block(z, blk)
      blk += 1
    branch_outs.append(z)
  cat = jnp.concatenate(branch_outs, axis=0)             # (paths*C, HW)

  # --- Hardswish: x * relu6(x + 3) / 6 ---------------------------------------
  act = cat * jnp.clip(cat + 3.0, 0.0, 6.0) * (1.0 / 6.0)

  # --- fc: 1x1 conv (paths*C -> C) with bias; (C,PC)@(PC,HW) on the MXU ------
  out = jnp.dot(fcw, act, precision=MM_PRECISION,
                preferred_element_type=jnp.float32) + fcb

  o_ref[...] = out[None].astype(o_ref.dtype)             # lane-dense store


def ghost_ffn(x_blc, params, H, W, paths):
  """GhostFFN forward.  x_blc: (B, L, C) with L == H*W, like the torch module."""
  B, L, C = x_blc.shape
  assert L == H * W
  assert W + 1 <= PAD, "spatial width too large for the fixed lane pad"
  nblk = paths * (paths + 1) // 2

  # ---- pack parameters with C on sublanes (grid-invariant, VMEM-resident) ---
  pww = params["pw_w"].astype(jnp.float32)                                    # (C, C)
  pwgn = jnp.stack([params["pw_g"], params["pw_b"]], axis=1).astype(jnp.float32)
  dww = jnp.transpose(params["dw_w"].reshape(nblk, C, 9), (1, 0, 2)).reshape(C, 9 * nblk)
  dwgn = jnp.transpose(jnp.stack([params["dw_g"], params["dw_b"]], axis=-1),
                       (1, 0, 2)).reshape(C, 2 * nblk)
  fcw = params["fc_w"].astype(jnp.float32)                                    # (C, paths*C)
  fcb = params["fc_b"].reshape(C, 1).astype(jnp.float32)

  # Column-wrap validity masks for the flattened depthwise taps (kw=0 / kw=2).
  w_idx = jnp.arange(L, dtype=jnp.int32) % W
  col_mask = jnp.stack([w_idx >= 1, w_idx <= W - 2]).astype(jnp.float32)      # (2, L)

  # (B, L, C) -> (B, C, L): channels on sublanes, H*W on lanes (lane-dense).
  x_cl = jnp.transpose(x_blc, (0, 2, 1)).astype(jnp.float32)

  kernel = functools.partial(_ghost_ffn_kernel, W=W, paths=paths)
  out_cl = pl.pallas_call(
      kernel,
      out_shape=jax.ShapeDtypeStruct((B, C, L), jnp.float32),
      grid=(B,),
      in_specs=[
          pl.BlockSpec((1, C, L), lambda b: (b, 0, 0)),      # activations
          pl.BlockSpec((2, L), lambda b: (0, 0)),            # column masks
          pl.BlockSpec((C, C), lambda b: (0, 0)),            # pw weight
          pl.BlockSpec((C, 2), lambda b: (0, 0)),            # pw GN gamma/beta
          pl.BlockSpec((C, 9 * nblk), lambda b: (0, 0)),     # dw weights
          pl.BlockSpec((C, 2 * nblk), lambda b: (0, 0)),     # dw GN gamma/beta
          pl.BlockSpec((C, paths * C), lambda b: (0, 0)),    # fc weight
          pl.BlockSpec((C, 1), lambda b: (0, 0)),            # fc bias
      ],
      out_specs=pl.BlockSpec((1, C, L), lambda b: (b, 0, 0)),
      scratch_shapes=[pltpu.VMEM((C, L + 2 * PAD), jnp.float32)],
      compiler_params=pltpu.CompilerParams(dimension_semantics=("parallel",)),
  )(x_cl, col_mask, pww, pwgn, dww, dwgn, fcw, fcb)

  return jnp.transpose(out_cl, (0, 2, 1))                  # back to (B, L, C)


def init_ghost_ffn(key, in_features, mlp_ratio):
  """Deterministic params matching GhostFFN(in_features, mlp_ratio) shapes."""
  C, paths = in_features, mlp_ratio
  nblk = paths * (paths + 1) // 2
  ks = jax.random.split(key, 8)
  return {
      "pw_w": 0.3 * jax.random.normal(ks[0], (C, C), jnp.float32),           # Conv2d(C,C,1), no bias
      "pw_g": 1.0 + 0.1 * jax.random.normal(ks[1], (C,), jnp.float32),
      "pw_b": 0.1 * jax.random.normal(ks[2], (C,), jnp.float32),
      "dw_w": 0.3 * jax.random.normal(ks[3], (nblk, C, 3, 3), jnp.float32),  # depthwise 3x3, no bias
      "dw_g": 1.0 + 0.1 * jax.random.normal(ks[4], (nblk, C), jnp.float32),
      "dw_b": 0.1 * jax.random.normal(ks[5], (nblk, C), jnp.float32),
      "fc_w": 0.2 * jax.random.normal(ks[6], (C, paths * C), jnp.float32),   # Conv2d(paths*C,C,1)
      "fc_b": 0.1 * jax.random.normal(ks[7], (C,), jnp.float32),
  }


# ----------------- pure-JAX reference used only for verification -------------
def _gn_ref(x, gamma, beta):
  mean = jnp.mean(x, axis=(1, 2, 3), keepdims=True)
  var = jnp.mean((x - mean) ** 2, axis=(1, 2, 3), keepdims=True)
  return ((x - mean) * jax.lax.rsqrt(var + EPS)
          * gamma[None, :, None, None] + beta[None, :, None, None])


def ghost_ffn_ref(x_blc, params, H, W, paths):
  B, L, C = x_blc.shape
  x = jnp.transpose(x_blc, (0, 2, 1)).reshape(B, C, H, W)
  y = jnp.einsum("oc,bchw->bohw", params["pw_w"], x, precision=MM_PRECISION)
  y = _gn_ref(y, params["pw_g"], params["pw_b"])
  blk, outs = 0, []
  for p in range(paths):
    z = y
    for _ in range(p + 1):
      w = params["dw_w"][blk][:, None, :, :]             # (C,1,3,3) OIHW, groups=C
      z = jax.lax.conv_general_dilated(
          z, w, window_strides=(1, 1), padding=((1, 1), (1, 1)),
          dimension_numbers=("NCHW", "OIHW", "NCHW"), feature_group_count=C,
          precision=MM_PRECISION)
      z = _gn_ref(z, params["dw_g"][blk], params["dw_b"][blk])
      blk += 1
    outs.append(z)
  cat = jnp.concatenate(outs, axis=1)
  act = cat * jnp.clip(cat + 3.0, 0.0, 6.0) * (1.0 / 6.0)          # Hardswish
  out = jnp.einsum("oc,bchw->bohw", params["fc_w"], act,
                   precision=MM_PRECISION) + params["fc_b"][None, :, None, None]
  return out.reshape(B, C, L).transpose(0, 2, 1)


if __name__ == "__main__":
  key = jax.random.PRNGKey(0)
  kx, kp = jax.random.split(key)

  B, C, H, W = 2, 8, 16, 16      # in_features=8, tokens L = H*W = 256
  mlp_ratio = 2                  # == paths of MultiGhostConv
  L = H * W

  x = jax.random.normal(kx, (B, L, C), jnp.float32)    # (B, L, C) like the torch module
  params = init_ghost_ffn(kp, C, mlp_ratio)

  out = jax.block_until_ready(ghost_ffn(x, params, H, W, mlp_ratio))
  ref = jax.block_until_ready(ghost_ffn_ref(x, params, H, W, mlp_ratio))

  assert out.shape == (B, L, C), out.shape
  err = float(jnp.max(jnp.abs(out - ref)))
  assert jnp.allclose(out, ref, atol=2e-3, rtol=2e-3), f"max abs err = {err}"
  print("KERNEL_OK")
</pallas_src>

<mosaic_0001>
module attributes {stable_mosaic.version = 11 : i64} {
  func.func @_ghost_ffn_kernel(%arg0: i32, %arg1: memref<1x8x256xf32, #tpu.memory_space<vmem>>, %arg2: memref<2x256xf32, #tpu.memory_space<vmem>>, %arg3: memref<8x8xf32, #tpu.memory_space<vmem>>, %arg4: memref<8x2xf32, #tpu.memory_space<vmem>>, %arg5: memref<8x27xf32, #tpu.memory_space<vmem>>, %arg6: memref<8x6xf32, #tpu.memory_space<vmem>>, %arg7: memref<8x16xf32, #tpu.memory_space<vmem>>, %arg8: memref<8x1xf32, #tpu.memory_space<vmem>>, %arg9: memref<1x8x256xf32, #tpu.memory_space<vmem>>, %arg10: memref<8x512xf32, #tpu.memory_space<vmem>>) attributes {dimension_semantics = [#tpu.dimension_semantics<parallel>], iteration_bounds = array<i64: 2>, scalar_prefetch = 0 : i64, scratch_operands = 1 : i64, tpu.core_type = #tpu.core_type<tc>, window_params = [{transform_indices = @transform_0, window_bounds = array<i64: 1, 8, 256>}, {pipeline_mode = #tpu.pipeline_mode<synchronous>, transform_indices = @transform_1, window_bounds = array<i64: 2, 256>}, {pipeline_mode = #tpu.pipeline_mode<synchronous>, transform_indices = @transform_2, window_bounds = array<i64: 8, 8>}, {pipeline_mode = #tpu.pipeline_mode<synchronous>, transform_indices = @transform_3, window_bounds = array<i64: 8, 2>}, {pipeline_mode = #tpu.pipeline_mode<synchronous>, transform_indices = @transform_4, window_bounds = array<i64: 8, 27>}, {pipeline_mode = #tpu.pipeline_mode<synchronous>, transform_indices = @transform_5, window_bounds = array<i64: 8, 6>}, {pipeline_mode = #tpu.pipeline_mode<synchronous>, transform_indices = @transform_6, window_bounds = array<i64: 8, 16>}, {pipeline_mode = #tpu.pipeline_mode<synchronous>, transform_indices = @transform_7, window_bounds = array<i64: 8, 1>}, {transform_indices = @transform_8, window_bounds = array<i64: 1, 8, 256>}]} {
    %c0 = arith.constant 0 : index
    %c0_0 = arith.constant 0 : index
    %c0_1 = arith.constant 0 : index
    %0 = vector.load %arg1[%c0, %c0_0, %c0_1] : memref<1x8x256xf32, #tpu.memory_space<vmem>>, vector<1x8x256xf32>
    %1 = vector.shape_cast %0 : vector<1x8x256xf32> to vector<8x256xf32>
    %c0_2 = arith.constant 0 : index
    %c0_3 = arith.constant 0 : index
    %2 = vector.load %arg2[%c0_2, %c0_3] : memref<2x256xf32, #tpu.memory_space<vmem>>, vector<2x256xf32>
    %c0_4 = arith.constant 0 : index
    %c0_5 = arith.constant 0 : index
    %3 = vector.load %arg3[%c0_4, %c0_5] : memref<8x8xf32, #tpu.memory_space<vmem>>, vector<8x8xf32>
    %c0_6 = arith.constant 0 : index
    %c0_7 = arith.constant 0 : index
    %4 = vector.load %arg4[%c0_6, %c0_7] : memref<8x2xf32, #tpu.memory_space<vmem>>, vector<8x2xf32>
    %c0_8 = arith.constant 0 : index
    %c0_9 = arith.constant 0 : index
    %5 = vector.load %arg5[%c0_8, %c0_9] : memref<8x27xf32, #tpu.memory_space<vmem>>, vector<8x27xf32>
    %c0_10 = arith.constant 0 : index
    %c0_11 = arith.constant 0 : index
    %6 = vector.load %arg6[%c0_10, %c0_11] : memref<8x6xf32, #tpu.memory_space<vmem>>, vector<8x6xf32>
    %c0_12 = arith.constant 0 : index
    %c0_13 = arith.constant 0 : index
    %7 = vector.load %arg7[%c0_12, %c0_13] : memref<8x16xf32, #tpu.memory_space<vmem>>, vector<8x16xf32>
    %c0_14 = arith.constant 0 : index
    %c0_15 = arith.constant 0 : index
    %8 = vector.load %arg8[%c0_14, %c0_15] : memref<8x1xf32, #tpu.memory_space<vmem>>, vector<8x1xf32>
    %9 = vector.extract_strided_slice %2 {offsets = [0, 0], sizes = [1, 256], strides = [1, 1]} : vector<2x256xf32> to vector<1x256xf32>
    %cst = arith.constant 5.000000e-01 : f32
    %10 = vector.broadcast %cst : f32 to vector<1x256xf32>
    %11 = arith.cmpf ogt, %9, %10 : vector<1x256xf32>
    %12 = vector.extract_strided_slice %2 {offsets = [1, 0], sizes = [1, 256], strides = [1, 1]} : vector<2x256xf32> to vector<1x256xf32>
    %cst_16 = arith.constant 5.000000e-01 : f32
    %13 = vector.broadcast %cst_16 : f32 to vector<1x256xf32>
    %14 = arith.cmpf ogt, %12, %13 : vector<1x256xf32>
    %cst_17 = arith.constant dense<0.000000e+00> : vector<8x256xf32>
    %15 = tpu.matmul %3, %1, %cst_17 {dimension_numbers = #tpu.dot_dimension_numbers<[1], [0], [0], [1], [0, 0, 1, 1], [], []>, precision = #tpu.contract_precision<fp32>} : vector<8x8xf32>, vector<8x256xf32>, vector<8x256xf32> -> vector<8x256xf32>
    %16 = vector.extract_strided_slice %4 {offsets = [0, 0], sizes = [8, 1], strides = [1, 1]} : vector<8x2xf32> to vector<8x1xf32>
    %17 = vector.extract_strided_slice %4 {offsets = [0, 1], sizes = [8, 1], strides = [1, 1]} : vector<8x2xf32> to vector<8x1xf32>
    %cst_18 = arith.constant dense<0.000000e+00> : vector<8xf32>
    %18 = vector.multi_reduction <add>, %15, %cst_18 [1] : vector<8x256xf32> to vector<8xf32>
    %19 = vector.shape_cast %18 : vector<8xf32> to vector<8x1xf32>
    %20 = arith.mulf %15, %15 : vector<8x256xf32>
    %cst_19 = arith.constant dense<0.000000e+00> : vector<8xf32>
    %21 = vector.multi_reduction <add>, %20, %cst_19 [1] : vector<8x256xf32> to vector<8xf32>
    %22 = vector.shape_cast %21 : vector<8xf32> to vector<8x1xf32>
    %cst_20 = arith.constant dense<0.000000e+00> : vector<1xf32>
    %23 = vector.multi_reduction <add>, %19, %cst_20 [0] : vector<8x1xf32> to vector<1xf32>
    %24 = vector.shape_cast %23 : vector<1xf32> to vector<1x1xf32>
    %cst_21 = arith.constant 4.8828125E-4 : f32
    %25 = vector.broadcast %cst_21 : f32 to vector<1x1xf32>
    %26 = arith.mulf %24, %25 : vector<1x1xf32>
    %cst_22 = arith.constant dense<0.000000e+00> : vector<1xf32>
    %27 = vector.multi_reduction <add>, %22, %cst_22 [0] : vector<8x1xf32> to vector<1xf32>
    %28 = vector.shape_cast %27 : vector<1xf32> to vector<1x1xf32>
    %cst_23 = arith.constant 4.8828125E-4 : f32
    %29 = vector.broadcast %cst_23 : f32 to vector<1x1xf32>
    %30 = arith.mulf %28, %29 : vector<1x1xf32>
    %31 = arith.mulf %26, %26 : vector<1x1xf32>
    %32 = arith.subf %30, %31 : vector<1x1xf32>
    %cst_24 = arith.constant 0.000000e+00 : f32
    %33 = vector.broadcast %cst_24 : f32 to vector<1x1xf32>
    %34 = arith.maximumf %32, %33 : vector<1x1xf32>
    %35 = vector.broadcast %26 : vector<1x1xf32> to vector<8x256xf32>
    %36 = arith.subf %15, %35 : vector<8x256xf32>
    %cst_25 = arith.constant 9.99999974E-6 : f32
    %37 = vector.broadcast %cst_25 : f32 to vector<1x1xf32>
    %38 = arith.addf %34, %37 : vector<1x1xf32>
    %39 = math.rsqrt %38 : vector<1x1xf32>
    %40 = vector.broadcast %39 : vector<1x1xf32> to vector<8x256xf32>
    %41 = arith.mulf %36, %40 : vector<8x256xf32>
    %42 = vector.broadcast %16 : vector<8x1xf32> to vector<8x256xf32>
    %43 = arith.mulf %41, %42 : vector<8x256xf32>
    %44 = vector.broadcast %17 : vector<8x1xf32> to vector<8x256xf32>
    %45 = arith.addf %43, %44 : vector<8x256xf32>
    %cst_26 = arith.constant 0.000000e+00 : f32
    %46 = vector.broadcast %cst_26 : f32 to vector<8x512xf32>
    %c0_27 = arith.constant 0 : index
    %c0_28 = arith.constant 0 : index
    %47 = vector.load %arg10[%c0_27, %c0_28] : memref<8x512xf32, #tpu.memory_space<vmem>>, vector<8x512xf32>
    tpu.vector_store %arg10[%c0_27, %c0_28], %46 {strides = array<i32>} : memref<8x512xf32, #tpu.memory_space<vmem>>, vector<8x512xf32>,
    %c0_29 = arith.constant 0 : index
    %c128 = arith.constant 128 : index
    %48 = vector.load %arg10[%c0_29, %c128] : memref<8x512xf32, #tpu.memory_space<vmem>>, vector<8x256xf32>
    tpu.vector_store %arg10[%c0_29, %c128], %45 {strides = array<i32>} : memref<8x512xf32, #tpu.memory_space<vmem>>, vector<8x256xf32>,
    %cst_30 = arith.constant 0.000000e+00 : f32
    %49 = vector.broadcast %cst_30 : f32 to vector<8x256xf32>
    %c0_31 = arith.constant 0 : index
    %c111 = arith.constant 111 : index
    %50 = vector.load %arg10[%c0_31, %c111] : memref<8x512xf32, #tpu.memory_space<vmem>>, vector<8x256xf32>
    %cst_32 = arith.constant 0.000000e+00 : f32
    %51 = vector.shape_cast %11 : vector<1x256xi1> to vector<1x256xi1>
    %52 = vector.broadcast %51 : vector<1x256xi1> to vector<8x256xi1>
    %53 = vector.broadcast %cst_32 : f32 to vector<8x256xf32>
    %54 = arith.select %52, %50, %53 : vector<8x256xi1>, vector<8x256xf32>
    %55 = vector.extract_strided_slice %5 {offsets = [0, 0], sizes = [8, 1], strides = [1, 1]} : vector<8x27xf32> to vector<8x1xf32>
    %56 = vector.broadcast %55 : vector<8x1xf32> to vector<8x256xf32>
    %57 = arith.mulf %54, %56 : vector<8x256xf32>
    %58 = arith.addf %49, %57 : vector<8x256xf32>
    %c0_33 = arith.constant 0 : index
    %c112 = arith.constant 112 : index
    %59 = vector.load %arg10[%c0_33, %c112] : memref<8x512xf32, #tpu.memory_space<vmem>>, vector<8x256xf32>
    %60 = vector.extract_strided_slice %5 {offsets = [0, 1], sizes = [8, 1], strides = [1, 1]} : vector<8x27xf32> to vector<8x1xf32>
    %61 = vector.broadcast %60 : vector<8x1xf32> to vector<8x256xf32>
    %62 = arith.mulf %59, %61 : vector<8x256xf32>
    %63 = arith.addf %58, %62 : vector<8x256xf32>
    %c0_34 = arith.constant 0 : index
    %c113 = arith.constant 113 : index
    %64 = vector.load %arg10[%c0_34, %c113] : memref<8x512xf32, #tpu.memory_space<vmem>>, vector<8x256xf32>
    %cst_35 = arith.constant 0.000000e+00 : f32
    %65 = vector.shape_cast %14 : vector<1x256xi1> to vector<1x256xi1>
    %66 = vector.broadcast %65 : vector<1x256xi1> to vector<8x256xi1>
    %67 = vector.broadcast %cst_35 : f32 to vector<8x256xf32>
    %68 = arith.select %66, %64, %67 : vector<8x256xi1>, vector<8x256xf32>
    %69 = vector.extract_strided_slice %5 {offsets = [0, 2], sizes = [8, 1], strides = [1, 1]} : vector<8x27xf32> to vector<8x1xf32>
    %70 = vector.broadcast %69 : vector<8x1xf32> to vector<8x256xf32>
    %71 = arith.mulf %68, %70 : vector<8x256xf32>
    %72 = arith.addf %63, %71 : vector<8x256xf32>
    %c0_36 = arith.constant 0 : index
    %c127 = arith.constant 127 : index
    %73 = vector.load %arg10[%c0_36, %c127] : memref<8x512xf32, #tpu.memory_space<vmem>>, vector<8x256xf32>
    %cst_37 = arith.constant 0.000000e+00 : f32
    %74 = vector.shape_cast %11 : vector<1x256xi1> to vector<1x256xi1>
    %75 = vector.broadcast %74 : vector<1x256xi1> to vector<8x256xi1>
    %76 = vector.broadcast %cst_37 : f32 to vector<8x256xf32>
    %77 = arith.select %75, %73, %76 : vector<8x256xi1>, vector<8x256xf32>
    %78 = vector.extract_strided_slice %5 {offsets = [0, 3], sizes = [8, 1], strides = [1, 1]} : vector<8x27xf32> to vector<8x1xf32>
    %79 = vector.broadcast %78 : vector<8x1xf32> to vector<8x256xf32>
    %80 = arith.mulf %77, %79 : vector<8x256xf32>
    %81 = arith.addf %72, %80 : vector<8x256xf32>
    %c0_38 = arith.constant 0 : index
    %c128_39 = arith.constant 128 : index
    %82 = vector.load %arg10[%c0_38, %c128_39] : memref<8x512xf32, #tpu.memory_space<vmem>>, vector<8x256xf32>
    %83 = vector.extract_strided_slice %5 {offsets = [0, 4], sizes = [8, 1], strides = [1, 1]} : vector<8x27xf32> to vector<8x1xf32>
    %84 = vector.broadcast %83 : vector<8x1xf32> to vector<8x256xf32>
    %85 = arith.mulf %82, %84 : vector<8x256xf32>
    %86 = arith.addf %81, %85 : vector<8x256xf32>
    %c0_40 = arith.constant 0 : index
    %c129 = arith.constant 129 : index
    %87 = vector.load %arg10[%c0_40, %c129] : memref<8x512xf32, #tpu.memory_space<vmem>>, vector<8x256xf32>
    %cst_41 = arith.constant 0.000000e+00 : f32
    %88 = vector.shape_cast %14 : vector<1x256xi1> to vector<1x256xi1>
    %89 = vector.broadcast %88 : vector<1x256xi1> to vector<8x256xi1>
    %90 = vector.broadcast %cst_41 : f32 to vector<8x256xf32>
    %91 = arith.select %89, %87, %90 : vector<8x256xi1>, vector<8x256xf32>
    %92 = vector.extract_strided_slice %5 {offsets = [0, 5], sizes = [8, 1], strides = [1, 1]} : vector<8x27xf32> to vector<8x1xf32>
    %93 = vector.broadcast %92 : vector<8x1xf32> to vector<8x256xf32>
    %94 = arith.mulf %91, %93 : vector<8x256xf32>
    %95 = arith.addf %86, %94 : vector<8x256xf32>
    %c0_42 = arith.constant 0 : index
    %c143 = arith.constant 143 : index
    %96 = vector.load %arg10[%c0_42, %c143] : memref<8x512xf32, #tpu.memory_space<vmem>>, vector<8x256xf32>
    %cst_43 = arith.constant 0.000000e+00 : f32
    %97 = vector.shape_cast %11 : vector<1x256xi1> to vector<1x256xi1>
    %98 = vector.broadcast %97 : vector<1x256xi1> to vector<8x256xi1>
    %99 = vector.broadcast %cst_43 : f32 to vector<8x256xf32>
    %100 = arith.select %98, %96, %99 : vector<8x256xi1>, vector<8x256xf32>
    %101 = vector.extract_strided_slice %5 {offsets = [0, 6], sizes = [8, 1], strides = [1, 1]} : vector<8x27xf32> to vector<8x1xf32>
    %102 = vector.broadcast %101 : vector<8x1xf32> to vector<8x256xf32>
    %103 = arith.mulf %100, %102 : vector<8x256xf32>
    %104 = arith.addf %95, %103 : vector<8x256xf32>
    %c0_44 = arith.constant 0 : index
    %c144 = arith.constant 144 : index
    %105 = vector.load %arg10[%c0_44, %c144] : memref<8x512xf32, #tpu.memory_space<vmem>>, vector<8x256xf32>
    %106 = vector.extract_strided_slice %5 {offsets = [0, 7], sizes = [8, 1], strides = [1, 1]} : vector<8x27xf32> to vector<8x1xf32>
    %107 = vector.broadcast %106 : vector<8x1xf32> to vector<8x256xf32>
    %108 = arith.mulf %105, %107 : vector<8x256xf32>
    %109 = arith.addf %104, %108 : vector<8x256xf32>
    %c0_45 = arith.constant 0 : index
    %c145 = arith.constant 145 : index
    %110 = vector.load %arg10[%c0_45, %c145] : memref<8x512xf32, #tpu.memory_space<vmem>>, vector<8x256xf32>
    %cst_46 = arith.constant 0.000000e+00 : f32
    %111 = vector.shape_cast %14 : vector<1x256xi1> to vector<1x256xi1>
    %112 = vector.broadcast %111 : vector<1x256xi1> to vector<8x256xi1>
    %113 = vector.broadcast %cst_46 : f32 to vector<8x256xf32>
    %114 = arith.select %112, %110, %113 : vector<8x256xi1>, vector<8x256xf32>
    %115 = vector.extract_strided_slice %5 {offsets = [0, 8], sizes = [8, 1], strides = [1, 1]} : vector<8x27xf32> to vector<8x1xf32>
    %116 = vector.broadcast %115 : vector<8x1xf32> to vector<8x256xf32>
    %117 = arith.mulf %114, %116 : vector<8x256xf32>
    %118 = arith.addf %109, %117 : vector<8x256xf32>
    %119 = vector.extract_strided_slice %6 {offsets = [0, 0], sizes = [8, 1], strides = [1, 1]} : vector<8x6xf32> to vector<8x1xf32>
    %120 = vector.extract_strided_slice %6 {offsets = [0, 1], sizes = [8, 1], strides = [1, 1]} : vector<8x6xf32> to vector<8x1xf32>
    %cst_47 = arith.constant dense<0.000000e+00> : vector<8xf32>
    %121 = vector.multi_reduction <add>, %118, %cst_47 [1] : vector<8x256xf32> to vector<8xf32>
    %122 = vector.shape_cast %121 : vector<8xf32> to vector<8x1xf32>
    %123 = arith.mulf %118, %118 : vector<8x256xf32>
    %cst_48 = arith.constant dense<0.000000e+00> : vector<8xf32>
    %124 = vector.multi_reduction <add>, %123, %cst_48 [1] : vector<8x256xf32> to vector<8xf32>
    %125 = vector.shape_cast %124 : vector<8xf32> to vector<8x1xf32>
    %cst_49 = arith.constant dense<0.000000e+00> : vector<1xf32>
    %126 = vector.multi_reduction <add>, %122, %cst_49 [0] : vector<8x1xf32> to vector<1xf32>
    %127 = vector.shape_cast %126 : vector<1xf32> to vector<1x1xf32>
    %cst_50 = arith.constant 4.8828125E-4 : f32
    %128 = vector.broadcast %cst_50 : f32 to vector<1x1xf32>
    %129 = arith.mulf %127, %128 : vector<1x1xf32>
    %cst_51 = arith.constant dense<0.000000e+00> : vector<1xf32>
    %130 = vector.multi_reduction <add>, %125, %cst_51 [0] : vector<8x1xf32> to vector<1xf32>
    %131 = vector.shape_cast %130 : vector<1xf32> to vector<1x1xf32>
    %cst_52 = arith.constant 4.8828125E-4 : f32
    %132 = vector.broadcast %cst_52 : f32 to vector<1x1xf32>
    %133 = arith.mulf %131, %132 : vector<1x1xf32>
    %134 = arith.mulf %129, %129 : vector<1x1xf32>
    %135 = arith.subf %133, %134 : vector<1x1xf32>
    %cst_53 = arith.constant 0.000000e+00 : f32
    %136 = vector.broadcast %cst_53 : f32 to vector<1x1xf32>
    %137 = arith.maximumf %135, %136 : vector<1x1xf32>
    %138 = vector.broadcast %129 : vector<1x1xf32> to vector<8x256xf32>
    %139 = arith.subf %118, %138 : vector<8x256xf32>
    %cst_54 = arith.constant 9.99999974E-6 : f32
    %140 = vector.broadcast %cst_54 : f32 to vector<1x1xf32>
    %141 = arith.addf %137, %140 : vector<1x1xf32>
    %142 = math.rsqrt %141 : vector<1x1xf32>
    %143 = vector.broadcast %142 : vector<1x1xf32> to vector<8x256xf32>
    %144 = arith.mulf %139, %143 : vector<8x256xf32>
    %145 = vector.broadcast %119 : vector<8x1xf32> to vector<8x256xf32>
    %146 = arith.mulf %144, %145 : vector<8x256xf32>
    %147 = vector.broadcast %120 : vector<8x1xf32> to vector<8x256xf32>
    %148 = arith.addf %146, %147 : vector<8x256xf32>
    %c0_55 = arith.constant 0 : index
    %c128_56 = arith.constant 128 : index
    %149 = vector.load %arg10[%c0_55, %c128_56] : memref<8x512xf32, #tpu.memory_space<vmem>>, vector<8x256xf32>
    tpu.vector_store %arg10[%c0_55, %c128_56], %45 {strides = array<i32>} : memref<8x512xf32, #tpu.memory_space<vmem>>, vector<8x256xf32>,
    %cst_57 = arith.constant 0.000000e+00 : f32
    %150 = vector.broadcast %cst_57 : f32 to vector<8x256xf32>
    %c0_58 = arith.constant 0 : index
    %c111_59 = arith.constant 111 : index
    %151 = vector.load %arg10[%c0_58, %c111_59] : memref<8x512xf32, #tpu.memory_space<vmem>>, vector<8x256xf32>
    %cst_60 = arith.constant 0.000000e+00 : f32
    %152 = vector.shape_cast %11 : vector<1x256xi1> to vector<1x256xi1>
    %153 = vector.broadcast %152 : vector<1x256xi1> to vector<8x256xi1>
    %154 = vector.broadcast %cst_60 : f32 to vector<8x256xf32>
    %155 = arith.select %153, %151, %154 : vector<8x256xi1>, vector<8x256xf32>
    %156 = vector.extract_strided_slice %5 {offsets = [0, 9], sizes = [8, 1], strides = [1, 1]} : vector<8x27xf32> to vector<8x1xf32>
    %157 = vector.broadcast %156 : vector<8x1xf32> to vector<8x256xf32>
    %158 = arith.mulf %155, %157 : vector<8x256xf32>
    %159 = arith.addf %150, %158 : vector<8x256xf32>
    %c0_61 = arith.constant 0 : index
    %c112_62 = arith.constant 112 : index
    %160 = vector.load %arg10[%c0_61, %c112_62] : memref<8x512xf32, #tpu.memory_space<vmem>>, vector<8x256xf32>
    %161 = vector.extract_strided_slice %5 {offsets = [0, 10], sizes = [8, 1], strides = [1, 1]} : vector<8x27xf32> to vector<8x1xf32>
    %162 = vector.broadcast %161 : vector<8x1xf32> to vector<8x256xf32>
    %163 = arith.mulf %160, %162 : vector<8x256xf32>
    %164 = arith.addf %159, %163 : vector<8x256xf32>
    %c0_63 = arith.constant 0 : index
    %c113_64 = arith.constant 113 : index
    %165 = vector.load %arg10[%c0_63, %c113_64] : memref<8x512xf32, #tpu.memory_space<vmem>>, vector<8x256xf32>
    %cst_65 = arith.constant 0.000000e+00 : f32
    %166 = vector.shape_cast %14 : vector<1x256xi1> to vector<1x256xi1>
    %167 = vector.broadcast %166 : vector<1x256xi1> to vector<8x256xi1>
    %168 = vector.broadcast %cst_65 : f32 to vector<8x256xf32>
    %169 = arith.select %167, %165, %168 : vector<8x256xi1>, vector<8x256xf32>
    %170 = vector.extract_strided_slice %5 {offsets = [0, 11], sizes = [8, 1], strides = [1, 1]} : vector<8x27xf32> to vector<8x1xf32>
    %171 = vector.broadcast %170 : vector<8x1xf32> to vector<8x256xf32>
    %172 = arith.mulf %169, %171 : vector<8x256xf32>
    %173 = arith.addf %164, %172 : vector<8x256xf32>
    %c0_66 = arith.constant 0 : index
    %c127_67 = arith.constant 127 : index
    %174 = vector.load %arg10[%c0_66, %c127_67] : memref<8x512xf32, #tpu.memory_space<vmem>>, vector<8x256xf32>
    %cst_68 = arith.constant 0.000000e+00 : f32
    %175 = vector.shape_cast %11 : vector<1x256xi1> to vector<1x256xi1>
    %176 = vector.broadcast %175 : vector<1x256xi1> to vector<8x256xi1>
    %177 = vector.broadcast %cst_68 : f32 to vector<8x256xf32>
    %178 = arith.select %176, %174, %177 : vector<8x256xi1>, vector<8x256xf32>
    %179 = vector.extract_strided_slice %5 {offsets = [0, 12], sizes = [8, 1], strides = [1, 1]} : vector<8x27xf32> to vector<8x1xf32>
    %180 = vector.broadcast %179 : vector<8x1xf32> to vector<8x256xf32>
    %181 = arith.mulf %178, %180 : vector<8x256xf32>
    %182 = arith.addf %173, %181 : vector<8x256xf32>
    %c0_69 = arith.constant 0 : index
    %c128_70 = arith.constant 128 : index
    %183 = vector.load %arg10[%c0_69, %c128_70] : memref<8x512xf32, #tpu.memory_space<vmem>>, vector<8x256xf32>
    %184 = vector.extract_strided_slice %5 {offsets = [0, 13], sizes = [8, 1], strides = [1, 1]} : vector<8x27xf32> to vector<8x1xf32>
    %185 = vector.broadcast %184 : vector<8x1xf32> to vector<8x256xf32>
    %186 = arith.mulf %183, %185 : vector<8x256xf32>
    %187 = arith.addf %182, %186 : vector<8x256xf32>
    %c0_71 = arith.constant 0 : index
    %c129_72 = arith.constant 129 : index
    %188 = vector.load %arg10[%c0_71, %c129_72] : memref<8x512xf32, #tpu.memory_space<vmem>>, vector<8x256xf32>
    %cst_73 = arith.constant 0.000000e+00 : f32
    %189 = vector.shape_cast %14 : vector<1x256xi1> to vector<1x256xi1>
    %190 = vector.broadcast %189 : vector<1x256xi1> to vector<8x256xi1>
    %191 = vector.broadcast %cst_73 : f32 to vector<8x256xf32>
    %192 = arith.select %190, %188, %191 : vector<8x256xi1>, vector<8x256xf32>
    %193 = vector.extract_strided_slice %5 {offsets = [0, 14], sizes = [8, 1], strides = [1, 1]} : vector<8x27xf32> to vector<8x1xf32>
    %194 = vector.broadcast %193 : vector<8x1xf32> to vector<8x256xf32>
    %195 = arith.mulf %192, %194 : vector<8x256xf32>
    %196 = arith.addf %187, %195 : vector<8x256xf32>
    %c0_74 = arith.constant 0 : index
    %c143_75 = arith.constant 143 : index
    %197 = vector.load %arg10[%c0_74, %c143_75] : memref<8x512xf32, #tpu.memory_space<vmem>>, vector<8x256xf32>
    %cst_76 = arith.constant 0.000000e+00 : f32
    %198 = vector.shape_cast %11 : vector<1x256xi1> to vector<1x256xi1>
    %199 = vector.broadcast %198 : vector<1x256xi1> to vector<8x256xi1>
    %200 = vector.broadcast %cst_76 : f32 to vector<8x256xf32>
    %201 = arith.select %199, %197, %200 : vector<8x256xi1>, vector<8x256xf32>
    %202 = vector.extract_strided_slice %5 {offsets = [0, 15], sizes = [8, 1], strides = [1, 1]} : vector<8x27xf32> to vector<8x1xf32>
    %203 = vector.broadcast %202 : vector<8x1xf32> to vector<8x256xf32>
    %204 = arith.mulf %201, %203 : vector<8x256xf32>
    %205 = arith.addf %196, %204 : vector<8x256xf32>
    %c0_77 = arith.constant 0 : index
    %c144_78 = arith.constant 144 : index
    %206 = vector.load %arg10[%c0_77, %c144_78] : memref<8x512xf32, #tpu.memory_space<vmem>>, vector<8x256xf32>
    %207 = vector.extract_strided_slice %5 {offsets = [0, 16], sizes = [8, 1], strides = [1, 1]} : vector<8x27xf32> to vector<8x1xf32>
    %208 = vector.broadcast %207 : vector<8x1xf32> to vector<8x256xf32>
    %209 = arith.mulf %206, %208 : vector<8x256xf32>
    %210 = arith.addf %205, %209 : vector<8x256xf32>
    %c0_79 = arith.constant 0 : index
    %c145_80 = arith.constant 145 : index
    %211 = vector.load %arg10[%c0_79, %c145_80] : memref<8x512xf32, #tpu.memory_space<vmem>>, vector<8x256xf32>
    %cst_81 = arith.constant 0.000000e+00 : f32
    %212 = vector.shape_cast %14 : vector<1x256xi1> to vector<1x256xi1>
    %213 = vector.broadcast %212 : vector<1x256xi1> to vector<8x256xi1>
    %214 = vector.broadcast %cst_81 : f32 to vector<8x256xf32>
    %215 = arith.select %213, %211, %214 : vector<8x256xi1>, vector<8x256xf32>
    %216 = vector.extract_strided_slice %5 {offsets = [0, 17], sizes = [8, 1], strides = [1, 1]} : vector<8x27xf32> to vector<8x1xf32>
    %217 = vector.broadcast %216 : vector<8x1xf32> to vector<8x256xf32>
    %218 = arith.mulf %215, %217 : vector<8x256xf32>
    %219 = arith.addf %210, %218 : vector<8x256xf32>
    %220 = vector.extract_strided_slice %6 {offsets = [0, 2], sizes = [8, 1], strides = [1, 1]} : vector<8x6xf32> to vector<8x1xf32>
    %221 = vector.extract_strided_slice %6 {offsets = [0, 3], sizes = [8, 1], strides = [1, 1]} : vector<8x6xf32> to vector<8x1xf32>
    %cst_82 = arith.constant dense<0.000000e+00> : vector<8xf32>
    %222 = vector.multi_reduction <add>, %219, %cst_82 [1] : vector<8x256xf32> to vector<8xf32>
    %223 = vector.shape_cast %222 : vector<8xf32> to vector<8x1xf32>
    %224 = arith.mulf %219, %219 : vector<8x256xf32>
    %cst_83 = arith.constant dense<0.000000e+00> : vector<8xf32>
    %225 = vector.multi_reduction <add>, %224, %cst_83 [1] : vector<8x256xf32> to vector<8xf32>
    %226 = vector.shape_cast %225 : vector<8xf32> to vector<8x1xf32>
    %cst_84 = arith.constant dense<0.000000e+00> : vector<1xf32>
    %227 = vector.multi_reduction <add>, %223, %cst_84 [0] : vector<8x1xf32> to vector<1xf32>
    %228 = vector.shape_cast %227 : vector<1xf32> to vector<1x1xf32>
    %cst_85 = arith.constant 4.8828125E-4 : f32
    %229 = vector.broadcast %cst_85 : f32 to vector<1x1xf32>
    %230 = arith.mulf %228, %229 : vector<1x1xf32>
    %cst_86 = arith.constant dense<0.000000e+00> : vector<1xf32>
    %231 = vector.multi_reduction <add>, %226, %cst_86 [0] : vector<8x1xf32> to vector<1xf32>
    %232 = vector.shape_cast %231 : vector<1xf32> to vector<1x1xf32>
    %cst_87 = arith.constant 4.8828125E-4 : f32
    %233 = vector.broadcast %cst_87 : f32 to vector<1x1xf32>
    %234 = arith.mulf %232, %233 : vector<1x1xf32>
    %235 = arith.mulf %230, %230 : vector<1x1xf32>
    %236 = arith.subf %234, %235 : vector<1x1xf32>
    %cst_88 = arith.constant 0.000000e+00 : f32
    %237 = vector.broadcast %cst_88 : f32 to vector<1x1xf32>
    %238 = arith.maximumf %236, %237 : vector<1x1xf32>
    %239 = vector.broadcast %230 : vector<1x1xf32> to vector<8x256xf32>
    %240 = arith.subf %219, %239 : vector<8x256xf32>
    %cst_89 = arith.constant 9.99999974E-6 : f32
    %241 = vector.broadcast %cst_89 : f32 to vector<1x1xf32>
    %242 = arith.addf %238, %241 : vector<1x1xf32>
    %243 = math.rsqrt %242 : vector<1x1xf32>
    %244 = vector.broadcast %243 : vector<1x1xf32> to vector<8x256xf32>
    %245 = arith.mulf %240, %244 : vector<8x256xf32>
    %246 = vector.broadcast %220 : vector<8x1xf32> to vector<8x256xf32>
    %247 = arith.mulf %245, %246 : vector<8x256xf32>
    %248 = vector.broadcast %221 : vector<8x1xf32> to vector<8x256xf32>
    %249 = arith.addf %247, %248 : vector<8x256xf32>
    %c0_90 = arith.constant 0 : index
    %c128_91 = arith.constant 128 : index
    %250 = vector.load %arg10[%c0_90, %c128_91] : memref<8x512xf32, #tpu.memory_space<vmem>>, vector<8x256xf32>
    tpu.vector_store %arg10[%c0_90, %c128_91], %249 {strides = array<i32>} : memref<8x512xf32, #tpu.memory_space<vmem>>, vector<8x256xf32>,
    %cst_92 = arith.constant 0.000000e+00 : f32
    %251 = vector.broadcast %cst_92 : f32 to vector<8x256xf32>
    %c0_93 = arith.constant 0 : index
    %c111_94 = arith.constant 111 : index
    %252 = vector.load %arg10[%c0_93, %c111_94] : memref<8x512xf32, #tpu.memory_space<vmem>>, vector<8x256xf32>
    %cst_95 = arith.constant 0.000000e+00 : f32
    %253 = vector.shape_cast %11 : vector<1x256xi1> to vector<1x256xi1>
    %254 = vector.broadcast %253 : vector<1x256xi1> to vector<8x256xi1>
    %255 = vector.broadcast %cst_95 : f32 to vector<8x256xf32>
    %256 = arith.select %254, %252, %255 : vector<8x256xi1>, vector<8x256xf32>
    %257 = vector.extract_strided_slice %5 {offsets = [0, 18], sizes = [8, 1], strides = [1, 1]} : vector<8x27xf32> to vector<8x1xf32>
    %258 = vector.broadcast %257 : vector<8x1xf32> to vector<8x256xf32>
    %259 = arith.mulf %256, %258 : vector<8x256xf32>
    %260 = arith.addf %251, %259 : vector<8x256xf32>
    %c0_96 = arith.constant 0 : index
    %c112_97 = arith.constant 112 : index
    %261 = vector.load %arg10[%c0_96, %c112_97] : memref<8x512xf32, #tpu.memory_space<vmem>>, vector<8x256xf32>
    %262 = vector.extract_strided_slice %5 {offsets = [0, 19], sizes = [8, 1], strides = [1, 1]} : vector<8x27xf32> to vector<8x1xf32>
    %263 = vector.broadcast %262 : vector<8x1xf32> to vector<8x256xf32>
    %264 = arith.mulf %261, %263 : vector<8x256xf32>
    %265 = arith.addf %260, %264 : vector<8x256xf32>
    %c0_98 = arith.constant 0 : index
    %c113_99 = arith.constant 113 : index
    %266 = vector.load %arg10[%c0_98, %c113_99] : memref<8x512xf32, #tpu.memory_space<vmem>>, vector<8x256xf32>
    %cst_100 = arith.constant 0.000000e+00 : f32
    %267 = vector.shape_cast %14 : vector<1x256xi1> to vector<1x256xi1>
    %268 = vector.broadcast %267 : vector<1x256xi1> to vector<8x256xi1>
    %269 = vector.broadcast %cst_100 : f32 to vector<8x256xf32>
    %270 = arith.select %268, %266, %269 : vector<8x256xi1>, vector<8x256xf32>
    %271 = vector.extract_strided_slice %5 {offsets = [0, 20], sizes = [8, 1], strides = [1, 1]} : vector<8x27xf32> to vector<8x1xf32>
    %272 = vector.broadcast %271 : vector<8x1xf32> to vector<8x256xf32>
    %273 = arith.mulf %270, %272 : vector<8x256xf32>
    %274 = arith.addf %265, %273 : vector<8x256xf32>
    %c0_101 = arith.constant 0 : index
    %c127_102 = arith.constant 127 : index
    %275 = vector.load %arg10[%c0_101, %c127_102] : memref<8x512xf32, #tpu.memory_space<vmem>>, vector<8x256xf32>
    %cst_103 = arith.constant 0.000000e+00 : f32
    %276 = vector.shape_cast %11 : vector<1x256xi1> to vector<1x256xi1>
    %277 = vector.broadcast %276 : vector<1x256xi1> to vector<8x256xi1>
    %278 = vector.broadcast %cst_103 : f32 to vector<8x256xf32>
    %279 = arith.select %277, %275, %278 : vector<8x256xi1>, vector<8x256xf32>
    %280 = vector.extract_strided_slice %5 {offsets = [0, 21], sizes = [8, 1], strides = [1, 1]} : vector<8x27xf32> to vector<8x1xf32>
    %281 = vector.broadcast %280 : vector<8x1xf32> to vector<8x256xf32>
    %282 = arith.mulf %279, %281 : vector<8x256xf32>
    %283 = arith.addf %274, %282 : vector<8x256xf32>
    %c0_104 = arith.constant 0 : index
    %c128_105 = arith.constant 128 : index
    %284 = vector.load %arg10[%c0_104, %c128_105] : memref<8x512xf32, #tpu.memory_space<vmem>>, vector<8x256xf32>
    %285 = vector.extract_strided_slice %5 {offsets = [0, 22], sizes = [8, 1], strides = [1, 1]} : vector<8x27xf32> to vector<8x1xf32>
    %286 = vector.broadcast %285 : vector<8x1xf32> to vector<8x256xf32>
    %287 = arith.mulf %284, %286 : vector<8x256xf32>
    %288 = arith.addf %283, %287 : vector<8x256xf32>
    %c0_106 = arith.constant 0 : index
    %c129_107 = arith.constant 129 : index
    %289 = vector.load %arg10[%c0_106, %c129_107] : memref<8x512xf32, #tpu.memory_space<vmem>>, vector<8x256xf32>
    %cst_108 = arith.constant 0.000000e+00 : f32
    %290 = vector.shape_cast %14 : vector<1x256xi1> to vector<1x256xi1>
    %291 = vector.broadcast %290 : vector<1x256xi1> to vector<8x256xi1>
    %292 = vector.broadcast %cst_108 : f32 to vector<8x256xf32>
    %293 = arith.select %291, %289, %292 : vector<8x256xi1>, vector<8x256xf32>
    %294 = vector.extract_strided_slice %5 {offsets = [0, 23], sizes = [8, 1], strides = [1, 1]} : vector<8x27xf32> to vector<8x1xf32>
    %295 = vector.broadcast %294 : vector<8x1xf32> to vector<8x256xf32>
    %296 = arith.mulf %293, %295 : vector<8x256xf32>
    %297 = arith.addf %288, %296 : vector<8x256xf32>
    %c0_109 = arith.constant 0 : index
    %c143_110 = arith.constant 143 : index
    %298 = vector.load %arg10[%c0_109, %c143_110] : memref<8x512xf32, #tpu.memory_space<vmem>>, vector<8x256xf32>
    %cst_111 = arith.constant 0.000000e+00 : f32
    %299 = vector.shape_cast %11 : vector<1x256xi1> to vector<1x256xi1>
    %300 = vector.broadcast %299 : vector<1x256xi1> to vector<8x256xi1>
    %301 = vector.broadcast %cst_111 : f32 to vector<8x256xf32>
    %302 = arith.select %300, %298, %301 : vector<8x256xi1>, vector<8x256xf32>
    %303 = vector.extract_strided_slice %5 {offsets = [0, 24], sizes = [8, 1], strides = [1, 1]} : vector<8x27xf32> to vector<8x1xf32>
    %304 = vector.broadcast %303 : vector<8x1xf32> to vector<8x256xf32>
    %305 = arith.mulf %302, %304 : vector<8x256xf32>
    %306 = arith.addf %297, %305 : vector<8x256xf32>
    %c0_112 = arith.constant 0 : index
    %c144_113 = arith.constant 144 : index
    %307 = vector.load %arg10[%c0_112, %c144_113] : memref<8x512xf32, #tpu.memory_space<vmem>>, vector<8x256xf32>
    %308 = vector.extract_strided_slice %5 {offsets = [0, 25], sizes = [8, 1], strides = [1, 1]} : vector<8x27xf32> to vector<8x1xf32>
    %309 = vector.broadcast %308 : vector<8x1xf32> to vector<8x256xf32>
    %310 = arith.mulf %307, %309 : vector<8x256xf32>
    %311 = arith.addf %306, %310 : vector<8x256xf32>
    %c0_114 = arith.constant 0 : index
    %c145_115 = arith.constant 145 : index
    %312 = vector.load %arg10[%c0_114, %c145_115] : memref<8x512xf32, #tpu.memory_space<vmem>>, vector<8x256xf32>
    %cst_116 = arith.constant 0.000000e+00 : f32
    %313 = vector.shape_cast %14 : vector<1x256xi1> to vector<1x256xi1>
    %314 = vector.broadcast %313 : vector<1x256xi1> to vector<8x256xi1>
    %315 = vector.broadcast %cst_116 : f32 to vector<8x256xf32>
    %316 = arith.select %314, %312, %315 : vector<8x256xi1>, vector<8x256xf32>
    %317 = vector.extract_strided_slice %5 {offsets = [0, 26], sizes = [8, 1], strides = [1, 1]} : vector<8x27xf32> to vector<8x1xf32>
    %318 = vector.broadcast %317 : vector<8x1xf32> to vector<8x256xf32>
    %319 = arith.mulf %316, %318 : vector<8x256xf32>
    %320 = arith.addf %311, %319 : vector<8x256xf32>
    %321 = vector.extract_strided_slice %6 {offsets = [0, 4], sizes = [8, 1], strides = [1, 1]} : vector<8x6xf32> to vector<8x1xf32>
    %322 = vector.extract_strided_slice %6 {offsets = [0, 5], sizes = [8, 1], strides = [1, 1]} : vector<8x6xf32> to vector<8x1xf32>
    %cst_117 = arith.constant dense<0.000000e+00> : vector<8xf32>
    %323 = vector.multi_reduction <add>, %320, %cst_117 [1] : vector<8x256xf32> to vector<8xf32>
    %324 = vector.shape_cast %323 : vector<8xf32> to vector<8x1xf32>
    %325 = arith.mulf %320, %320 : vector<8x256xf32>
    %cst_118 = arith.constant dense<0.000000e+00> : vector<8xf32>
    %326 = vector.multi_reduction <add>, %325, %cst_118 [1] : vector<8x256xf32> to vector<8xf32>
    %327 = vector.shape_cast %326 : vector<8xf32> to vector<8x1xf32>
    %cst_119 = arith.constant dense<0.000000e+00> : vector<1xf32>
    %328 = vector.multi_reduction <add>, %324, %cst_119 [0] : vector<8x1xf32> to vector<1xf32>
    %329 = vector.shape_cast %328 : vector<1xf32> to vector<1x1xf32>
    %cst_120 = arith.constant 4.8828125E-4 : f32
    %330 = vector.broadcast %cst_120 : f32 to vector<1x1xf32>
    %331 = arith.mulf %329, %330 : vector<1x1xf32>
    %cst_121 = arith.constant dense<0.000000e+00> : vector<1xf32>
    %332 = vector.multi_reduction <add>, %327, %cst_121 [0] : vector<8x1xf32> to vector<1xf32>
    %333 = vector.shape_cast %332 : vector<1xf32> to vector<1x1xf32>
    %cst_122 = arith.constant 4.8828125E-4 : f32
    %334 = vector.broadcast %cst_122 : f32 to vector<1x1xf32>
    %335 = arith.mulf %333, %334 : vector<1x1xf32>
    %336 = arith.mulf %331, %331 : vector<1x1xf32>
    %337 = arith.subf %335, %336 : vector<1x1xf32>
    %cst_123 = arith.constant 0.000000e+00 : f32
    %338 = vector.broadcast %cst_123 : f32 to vector<1x1xf32>
    %339 = arith.maximumf %337, %338 : vector<1x1xf32>
    %340 = vector.broadcast %331 : vector<1x1xf32> to vector<8x256xf32>
    %341 = arith.subf %320, %340 : vector<8x256xf32>
    %cst_124 = arith.constant 9.99999974E-6 : f32
    %342 = vector.broadcast %cst_124 : f32 to vector<1x1xf32>
    %343 = arith.addf %339, %342 : vector<1x1xf32>
    %344 = math.rsqrt %343 : vector<1x1xf32>
    %345 = vector.broadcast %344 : vector<1x1xf32> to vector<8x256xf32>
    %346 = arith.mulf %341, %345 : vector<8x256xf32>
    %347 = vector.broadcast %321 : vector<8x1xf32> to vector<8x256xf32>
    %348 = arith.mulf %346, %347 : vector<8x256xf32>
    %349 = vector.broadcast %322 : vector<8x1xf32> to vector<8x256xf32>
    %350 = arith.addf %348, %349 : vector<8x256xf32>
    %351 = tpu.concatenate %148, %350 in 0 : vector<8x256xf32>, vector<8x256xf32> -> vector<16x256xf32>
    %cst_125 = arith.constant 3.000000e+00 : f32
    %352 = vector.broadcast %cst_125 : f32 to vector<16x256xf32>
    %353 = arith.addf %351, %352 : vector<16x256xf32>
    %cst_126 = arith.constant 0.000000e+00 : f32
    %cst_127 = arith.constant 6.000000e+00 : f32
    %354 = vector.broadcast %cst_126 : f32 to vector<16x256xf32>
    %355 = arith.maximumf %354, %353 : vector<16x256xf32>
    %356 = vector.broadcast %cst_127 : f32 to vector<16x256xf32>
    %357 = arith.minimumf %356, %355 : vector<16x256xf32>
    %358 = arith.mulf %351, %357 : vector<16x256xf32>
    %cst_128 = arith.constant 0.166666672 : f32
    %359 = vector.broadcast %cst_128 : f32 to vector<16x256xf32>
    %360 = arith.mulf %358, %359 : vector<16x256xf32>
    %cst_129 = arith.constant dense<0.000000e+00> : vector<8x256xf32>
    %361 = tpu.matmul %7, %360, %cst_129 {dimension_numbers = #tpu.dot_dimension_numbers<[1], [0], [0], [1], [0, 0, 1, 1], [], []>, precision = #tpu.contract_precision<fp32>} : vector<8x16xf32>, vector<16x256xf32>, vector<8x256xf32> -> vector<8x256xf32>
    %362 = vector.broadcast %8 : vector<8x1xf32> to vector<8x256xf32>
    %363 = arith.addf %361, %362 : vector<8x256xf32>
    %364 = vector.shape_cast %363 : vector<8x256xf32> to vector<1x8x256xf32>
    %c0_130 = arith.constant 0 : index
    %c0_131 = arith.constant 0 : index
    %c0_132 = arith.constant 0 : index
    %365 = vector.load %arg9[%c0_130, %c0_131, %c0_132] : memref<1x8x256xf32, #tpu.memory_space<vmem>>, vector<1x8x256xf32>
    tpu.vector_store %arg9[%c0_130, %c0_131, %c0_132], %364 {strides = array<i32>} : memref<1x8x256xf32, #tpu.memory_space<vmem>>, vector<1x8x256xf32>,
    return
  }
  func.func @transform_0(%arg0: i32) -> (i32, i32, i32) {
    %c0_i32 = arith.constant 0 : i32
    %c0_i32_0 = arith.constant 0 : i32
    %c0_i32_1 = arith.constant 0 : i32
    return %arg0, %c0_i32, %c0_i32_0 : i32, i32, i32
  }
  func.func @transform_1(%arg0: i32) -> (i32, i32) {
    %c0_i32 = arith.constant 0 : i32
    %c0_i32_0 = arith.constant 0 : i32
    %c0_i32_1 = arith.constant 0 : i32
    return %c0_i32, %c0_i32_0 : i32, i32
  }
  func.func @transform_2(%arg0: i32) -> (i32, i32) {
    %c0_i32 = arith.constant 0 : i32
    %c0_i32_0 = arith.constant 0 : i32
    %c0_i32_1 = arith.constant 0 : i32
    return %c0_i32, %c0_i32_0 : i32, i32
  }
  func.func @transform_3(%arg0: i32) -> (i32, i32) {
    %c0_i32 = arith.constant 0 : i32
    %c0_i32_0 = arith.constant 0 : i32
    %c0_i32_1 = arith.constant 0 : i32
    return %c0_i32, %c0_i32_0 : i32, i32
  }
  func.func @transform_4(%arg0: i32) -> (i32, i32) {
    %c0_i32 = arith.constant 0 : i32
    %c0_i32_0 = arith.constant 0 : i32
    %c0_i32_1 = arith.constant 0 : i32
    return %c0_i32, %c0_i32_0 : i32, i32
  }
  func.func @transform_5(%arg0: i32) -> (i32, i32) {
    %c0_i32 = arith.constant 0 : i32
    %c0_i32_0 = arith.constant 0 : i32
    %c0_i32_1 = arith.constant 0 : i32
    return %c0_i32, %c0_i32_0 : i32, i32
  }
  func.func @transform_6(%arg0: i32) -> (i32, i32) {
    %c0_i32 = arith.constant 0 : i32
    %c0_i32_0 = arith.constant 0 : i32
    %c0_i32_1 = arith.constant 0 : i32
    return %c0_i32, %c0_i32_0 : i32, i32
  }
  func.func @transform_7(%arg0: i32) -> (i32, i32) {
    %c0_i32 = arith.constant 0 : i32
    %c0_i32_0 = arith.constant 0 : i32
    %c0_i32_1 = arith.constant 0 : i32
    return %c0_i32, %c0_i32_0 : i32, i32
  }
  func.func @transform_8(%arg0: i32) -> (i32, i32, i32) {
    %c0_i32 = arith.constant 0 : i32
    %c0_i32_0 = arith.constant 0 : i32
    %c0_i32_1 = arith.constant 0 : i32
    return %arg0, %c0_i32, %c0_i32_0 : i32, i32, i32
  }
}

</mosaic_0001>

<bundles_post_ra>
// kernel: tpu_custom_call.1
= control target key start
LH: loop header
LB: loop body
LE: loop exit
PB: predicated region body
PF: predicated region fallthrough
CT: control target
= control target key end

     0   :  { %s3193_s0 = inlined_call_operand.hbm [shape: f32[2,8,256], index: 0, kind: input, shape index: {}]   ;;  %s3194_s1 = inlined_call_operand.hbm [shape: f32[2,256], index: 1, kind: input, shape index: {}]   ;;  %s3195_s2 = inlined_call_operand.vmem [shape: f32[8,8], index: 2, kind: input, shape index: {}]   ;;  %s3196_s3 = inlined_call_operand.vmem [shape: f32[8,2], index: 3, kind: input, shape index: {}]   ;;  %s3197_s4 = inlined_call_operand.vmem [shape: f32[8,27], index: 4, kind: input, shape index: {}]   ;;  %s3198_s5 = inlined_call_operand.hbm [shape: f32[8,6], index: 5, kind: input, shape index: {}]   ;;  %s3199_s6 = inlined_call_operand.hbm [shape: f32[8,16], index: 6, kind: input, shape index: {}]   ;;  %s3200_s7 = inlined_call_operand.vmem [shape: f32[8,1], index: 7, kind: input, shape index: {}]   ;;  %s3201_s8 = inlined_call_operand.hbm [shape: f32[2,8,256], index: 8, kind: output, shape index: {}]  }
   0x1   :  { %3202 = sst [smem:[#allocation16_spill]] %s3194_s1 }
   0x2   :  { %3203 = sst [smem:[#allocation17_spill]] %s3198_s5 }
   0x3   :  { %13 = vsyncpa [#allocation4], 0 }
   0x4   :  { %15 = vsyncpa [#allocation4 + $0x1], 0 }
   0x5   :  { %16 = vsyncpa [#allocation7], 0 }
   0x6   :  { %17 = vsyncpa [#allocation10], 0 }
   0x7   :  { %18 = vsyncpa [#allocation5], 0 }
   0x8   :  { %20 = vsyncpa [#allocation5 + $0x1], 0  ;;  %s2422_s27 = smov 0   ;;  %s2424_s28 = smov 0  }
   0x9   :  { %s2426_s29 = smov 0   ;;  %s2428_s30 = smov 0  }
   0xa LB: > { %s2443_s9 = sadd.s32 4294967295, %s2336_s30   ;;  %s1932_s10 = sadd.s32 4294967294, %s2336_s30   ;;  %s2336_s30 = sphi %s2428_s30, %s3215_s30   ;;  %s2332_s29 = sphi %s2426_s29, %s3214_s29   ;;  %s2328_s28 = sphi %s2424_s28, %s3213_s28   ;;  %s2324_s27 = sphi %s2422_s27, %s3212_s27  }
   0xb   : > { %p46_p0 = scmp.ne.s32.totalorder %s2328_s28, %s2324_s27  ;;  %p47_p1 = scmp.eq.s32.totalorder %s2443_s9, 0 }
   0xc   : > { %p217_p2 = scmp.eq.s32.totalorder %s2443_s9, 1  ;;  %p223_p3 = scmp.eq.s32.totalorder %s1932_s10, 1 }
   0xd   : > { %p2452_p4 = por %p47_p1, %p46_p0  ;;  %p1933_p5 = scmp.ge.s32.totalorder %s2336_s30, 1 }
   0xe   : > { %p2457_p6 = por %p223_p3, %p46_p0  ;;  %p230_p7 = scmp.lt.s32.totalorder %s2336_s30, 3 }
   0xf   : > { %s3206_s1 = sld [smem:[#allocation16_spill]]  ;;  %s2338_s17 = smov [#allocation6]  }
  0x10   : > { %p2465_p8 = pnand %p1933_p5, %p230_p7  ;;  %s244_s18 = sshll.u32 %s2338_s17, 4  ;;  %s245_s18 = int_to_ptr.vmem [resolvable:$true] %s244_s18 }
  0x11   : > { %s3208_s5 = sld [smem:[#allocation17_spill]]  ;;  %s275_s24 = sshll.u32 %s3199_s6, 4  ;;  %s276_s24 = int_to_ptr.hbm [resolvable:$true] %s275_s24 }
  0x12   : > { %p1970_p10 = pneg %p2465_p8  ;;  %s2339_s25 = smov [#allocation8]  }
  0x13   : > { %s265_s26 = sshll.u32 %s2339_s25, 4  ;;  %s2340_s10 = smov [#allocation9]   ;;  %s266_s26 = int_to_ptr.vmem [resolvable:$true] %s265_s26 }
  0x14   : > { %p1971_p11 = pnand %p1970_p10, %p47_p1  ;;  %s277_s13 = sshll.u32 %s2340_s10, 4  ;;  %s278_s13 = int_to_ptr.vmem [resolvable:$true] %s277_s13 }
  0x15   : > { %s242_s15 = sshll.u32 %s3206_s1, 4  ;;  %s2481_s14 = sadd.s32 1, %s2336_s30   ;;  %s243_s15 = int_to_ptr.hbm [resolvable:$true] %s242_s15 }
  0x16   : > { %1973 = dma.hbm_to_vmem [thread:$0]  (!%p1971_p11), %s243_s15, 64, %s245_s18, [#allocation7]  }
  0x17   : > { %s263_s21 = sshll.u32 %s3208_s5, 4  ;;  %s30_s17 = ssub.s32 %s2336_s30, %s2481_s14  ;;  %s264_s21 = int_to_ptr.hbm [resolvable:$true] %s263_s21 }
  0x18   : > { %1976 = dma.hbm_to_vmem [thread:$0]  (!%p1971_p11), %s264_s21, 128, %s266_s26, [#allocation7]  }
  0x19   : > { %1979 = dma.hbm_to_vmem [thread:$0]  (!%p1971_p11), %s276_s24, 128, %s278_s13, [#allocation10]  }
  0x1a   : > { %s33_s19 = sadd.s32 1, %s2332_s29  ;;  %p31_p12 = scmp.eq.s32.totalorder %s30_s17, 0 }
  0x1b   : > { %p40_p13 = scmp.ne.s32.totalorder %s2332_s29, %s2328_s28  ;;  %p41_p0 = scmp.eq.s32.totalorder %s2336_s30, 0 }
  0x1c   : > { %s2490_s20 = scalar_select %p31_p12, %s2332_s29, %s33_s19  }
  0x1d   : > { %p2494_p3 = por %p217_p2, %p40_p13  ;;  %p1991_p5 = scmp.lt.s32.totalorder %s2336_s30, 2 }
  0x1e   : > { %s291_s18 = sand.u32 1, %s2332_s29   ;;  %s1952_s21 = sshll.u32 %s2336_s30, 4 }
  0x1f   : > { %p42_p7 = por %p41_p0, %p40_p13  ;;  %s1938_s22 = sshll.u32 %s291_s18, 4 }
  0x20   : > { %s300_s24 = scalar_lea.hbm %s3193_s0, %s1952_s21  ;;  %s295_s10 = scalar_lea.vmem [#allocation3], %s1938_s22 }
  0x21   : > { %s302_s26 = sshll.u32 %s300_s24, 4  ;;  %s304_s13 = sshll.u32 %s295_s10, 4  ;;  %s303_s26 = int_to_ptr.hbm [resolvable:$true] %s302_s26  ;;  %s305_s13 = int_to_ptr.vmem [resolvable:$true] %s304_s13 }
  0x22   : > { %p2504_p10 = pnand %p1991_p5, %p42_p7  ;;  %s292_s19 = scalar_lea.sflag [#allocation4], %s291_s18 }
  0x23   : > { %s2232_s1 = sshra.s32 %s303_s26, 4  ;;  %s2239_s22 = scalar_lea.hbm %s3193_s0, 32  ;;  %s2233_s1 = int_to_ptr.hbm [resolvable:$true] %s2232_s1 }
  0x24   : > { %s2234_s5 = scalar_lea.hbm %s2233_s1, 16  ;;  %p2236_p11 = pneg %p2504_p10 }
  0x25   : > { %p2235_p2 = scmp.ne.s32.totalorder %s2233_s1, %s2234_s5  ;;  %p2240_p0 = scmp.lt.s32.totalorder %s2233_s1, %s3193_s0 }
  0x26   : > { %p2241_p5 = scmp.lt.s32.totalorder %s2239_s22, %s2234_s5 }
  0x27   : > { %p2237_p12 = pnand %p2236_p11, %p2235_p2 }
  0x28   : > { %p2242_p7 = por %p2241_p5, %p2240_p0 }
  0x29   : > { %p2238_p13 = pneg %p2237_p12 }
  0x2b   : > { %p2243_p9 = pnand %p2242_p7, %p2238_p13 }
  0x2d   : > { %2246 = shalt.err (!%p2243_p9)
}
  0x2e   : > { %1983 = dma.hbm_to_vmem [thread:$0]  (!%p2504_p10), %s303_s26, 256, %s305_s13, %s292_s19  }
  0x2f   : > { %313 = sbr.rel (%p2465_p8) target bundleno = 1311 (0x51f), region = 52  ;;  %s2521_s18 = sand.u32 (!%p2465_p8), 1, %s2328_s28  }
  0x30   : > { %s1942_s10 = sshll.u32 (!%p2465_p8), %s2521_s18, 4  ;;  %s316_s21 = scalar_lea.sflag (!%p2465_p8), [#allocation4], %s2521_s18 }
  0x31   : > { %s319_s1 = scalar_lea.vmem (!%p2465_p8), [#allocation3], %s1942_s10 }
  0x34   : > { %2307 = dma.done.wait (%p2452_p4), %s316_s21, 256  }
  0x35   : > { %2309 = vsyncadd (%p2452_p4), %s316_s21, 4294967040 }
  0x36   : > { %2311 = dma.done.wait (%p47_p1), [#allocation7], 192  }
  0x37   : > { %2313 = vsyncadd (%p47_p1), [#allocation7], 4294967104 }
  0x38   : > { %2315 = dma.done.wait (%p47_p1), [#allocation10], 128  }
  0x39   : > { %2317 = vsyncadd (%p47_p1), [#allocation10], 4294967168  ;;  %v2341_v0 = vmov 9   ;;  %vm378_vm0 = vcmask 64512   ;;  %v2342_v1 = vmov 0.0   ;;  %s2343_s5 = smov 17  }
  0x3a   : > { %2078 = vset.pattern.permute.xlu0 %v2341_v0  ;;  %v368_v2 = vld [vmem:[%s319_s1] sm:$0xff]  ;;  %v369_v4 = vld [vmem:[%s319_s1 + $0x8] sm:$0xff]  ;;  %s2344_s17 = smov 1   ;;  %v2345_v22 = vmov 12   ;;  %v2346_v23 = vmov 14   ;;  %v2347_v24 = vmov 17  }
  0x3b   : > { %2068 = vrot.lane.b32.xlu0 %v2342_v1, %s2343_s5  ;;  %v371_v3 = vld [vmem:[%s3195_s2] sm:$0xff]  ;;  %v397_v5 = vand.u32 4294901760, %v368_v2  ;;  %v543_v7 = vand.u32 4294901760, %v369_v4  ;;  %v2348_v30 = vmov 10   ;;  %v2349_v31 = vmov 0   ;;  %s2353_s22 = smov 15  }
  0x3c   : > { %v380_v6 = vsel %vm378_vm0, %v371_v3, 0  ;;  %v2547_v15 = vld [vmem:[%s3197_s4] sm:$0xff]  ;;  %2074 = vset.pattern.permute.xlu2 %v2348_v30  ;;  %2072 = vset.pattern.permute.xlu1 %v2349_v31  ;;  %v2350_v32 = vmov 2   ;;  %v2351_v39 = vmov 16   ;;  %v2352_v40 = vmov 1   ;;  %s2356_s25 = smov 127  }
  0x3d   : > { %v399_v8 = vand.u32 4294901760, %v380_v6  ;;  %v424_v9 = vsub.f32 %v368_v2, %v397_v5  ;;  %474 = vmatpush.msra.mxu3 %v397_v5  ;;  %398 = vmatpush.msra.mxu0 %v397_v5  ;;  %v570_v10 = vsub.f32 %v369_v4, %v543_v7  ;;  %v372_v29 = vld [vmem:[%s3196_s3] sm:$0xff]  ;;  %v2354_v56 = vmov 13   ;;  %s2358_s24 = smov 113   ;;  %s2359_s21 = smov 111  }
  0x3e   : > { %1021 = vperm.xlu2 %2074, %v2547_v15   ;;  %716 = vperm.xlu1 %2072, %v372_v29   ;;  %v2355_v58 = vmov 11   ;;  %v2357_v59 = vmov 15   ;;  %v2586_v60 = vld [vmem:[#allocation8] sm:$0xff]  ;;  %v2360_v61 = vmov 7   ;;  %s2361_s1 = smov 16   ;;  %s2362_s11 = smov 112  }
  0x3f   : > { %v400_v11 = vsub.f32 %v380_v6, %v399_v8  ;;  %451 = vmatpush.msra.mxu2 %v424_v9  ;;  %v425_v12 = vand.u32 4294901760, %v424_v9  ;;  %v571_v13 = vand.u32 4294901760, %v570_v10  ;;  %vm752_vm5 = vcmask 138240   ;;  %s1953_s19 = sshll.u32 %s2443_s9, 4  ;;  %s2282_s16 = scalar_lea.hbm %s3201_s8, 32 }
  0x40   : > { %vm803_vm6 = vcmask 121856   ;;  %vm784_vm9 = vcmask 130048   ;;  %vm824_vm10 = vcmask 7168   ;;  %vm859_vm11 = vcmask 1039360  }
  0x41   : > { %454 = vmatmul.f32.vlgmr.msra.gmra.mxu2 %v400_v11  ;;  %v401_v14 = vand.u32 4294901760, %v400_v11  ;;  %v426_v16 = vsub.f32 %v424_v9, %v425_v12  ;;  %500 = vmatpush.msrb.mxu0 %v425_v12  ;;  %v572_v17 = vsub.f32 %v570_v10, %v571_v13  ;;  %vm880_vm12 = vcmask 924672  }
  0x42   : > { %544 = vmatpush.msrb.mxu2 %v543_v7  ;;  %vm924_vm15 = vcmask 908288   ;;  %vm911_vm0 = vcmask 916480  }
  0x43   : > { %478 = vmatmul.f32.vlgmr.msra.gmra.mxu3 %v401_v14  ;;  %v402_v18 = vsub.f32 %v400_v11, %v401_v14  ;;  %v427_v19 = vand.u32 4294901760, %v426_v16  ;;  %v573_v20 = vand.u32 4294901760, %v572_v17  ;;  %1013 = vperm.xlu0 %2078, %v2547_v15  }
  0x44   : > { %646 = vmatpush.msra.mxu2 %v571_v13 }
  0x45   : > { %v403_v21 = vand.u32 4294901760, %v402_v18  ;;  %428 = vmatpush.msra.mxu1 %v427_v19  ;;  %574 = vmatpush.msrb.mxu3 %v573_v20  ;;  %v2364_v20 = vmov 25  }
  0x46   : > { %430 = vmatmul.f32.vlgmr.msra.gmra.mxu1 %v399_v8  ;;  %2075 = vset.pattern.permute.xlu2 %v2351_v39 }
  0x47   : > { %404 = vmatmul.f32.vlgmr.msra.gmra.mxu0 %v403_v21  ;;  %522 = vmatpush.msrb.mxu1 %v397_v5 }
  0x48   : > { %597 = vmatpush.msra.mxu0 %v570_v10  ;;  %668 = vmatpush.msra.mxu3 %v543_v7 }
  0x49   : > { %550 = vmatmul.f32.vlgmr.msrb.gmra.mxu2 %v403_v21  ;;  %620 = vmatpush.msra.mxu1 %v543_v7  ;;  %v2363_v7 = vmov 19  }
  0x4a   : > { %2073 = vset.pattern.permute.xlu1 %v2352_v40  ;;  %1137 = vperm.xlu2 %2075, %v2547_v15  }
  0x4b   : > { %576 = vmatmul.f32.vlgmr.msrb.gmra.mxu3 %v399_v8  ;;  %2086 = vrot.lane.b32.xlu0 %v2342_v1, %s2344_s17 }
  0x4c   : > { %2090 = vset.pattern.permute.xlu0 %v2345_v22  ;;  %722 = vperm.xlu1 %2073, %v372_v29  }
  0x4e   : > { %524 = vmatmul.f32.vlgmr.msrb.gmra.mxu1 %v399_v8 }
  0x4f   : > { %502 = vmatmul.f32.vlgmr.msrb.gmra.mxu0 %v399_v8 }
  0x51   : > { %648 = vmatmul.f32.vlgmr.msra.gmra.mxu2 %v399_v8 }
  0x52   : > { %2077 = vset.pattern.permute.xlu2 %v2352_v40 }
  0x53   : > { %670 = vmatmul.f32.vlgmr.msra.gmra.mxu3 %v399_v8  ;;  %1075 = vperm.xlu0 %2090, %v2547_v15  }
  0x54   : > { %2076 = vset.pattern.permute.xlu1 %v2349_v31  ;;  %769 = vperm.xlu2 %2077, %v2547_v15  }
  0x55   : > { %761 = vperm.xlu1 %2076, %v2547_v15  }
  0x56   : > { %624 = vmatmul.f32.vlgmr.msra.gmra.mxu1 %v401_v14 }
  0x57   : > { %600 = vmatmul.f32.vlgmr.msra.gmra.mxu0 %v400_v11 }
  0x5b   : > { %2092 = vset.pattern.permute.xlu0 %v2346_v23 }
  0x5c   : > { %1109 = vperm.xlu0 %2092, %v2547_v15   ;;  %2084 = vset.pattern.permute.xlu2 %v2355_v58 }
  0x5d   : > { %2080 = vrot.lane.b32.xlu1 %v2342_v1, %s2353_s22  ;;  %1055 = vperm.xlu2 %2084, %v2547_v15  }
  0x5e   : > { %2091 = vset.pattern.permute.xlu1 %v2354_v56 }
  0x64   : > { %2094 = vset.pattern.permute.xlu0 %v2347_v24 }
  0x65   : > { %1171 = vperm.xlu0 %2094, %v2547_v15   ;;  %1083 = vperm.xlu1 %2091, %v2547_v15  }
  0x66   : > { %1100 = vrot.lane.b32.xlu2 %v2342_v1, %s2356_s25 }
  0x67   : > { %2093 = vset.pattern.permute.xlu2 %v2357_v59 }
  0x6d   : > { %2095 = vset.pattern.permute.xlu0 %v2350_v32  ;;  %1120 = vrot.lane.b32.xlu1 %v2342_v1, %s2358_s24 }
  0x6e   : > { %1129 = vperm.xlu2 %2093, %v2547_v15   ;;  %2097 = vset.pattern.permute.xlu1 %v2364_v20 }
  0x75   : > { %1375 = vperm.xlu1 %2097, %v2547_v15  }
  0x76   : > { %1162 = vrot.lane.b32.xlu2 %v2342_v1, %s2359_s21 }
  0x77   : > { %2096 = vset.pattern.permute.xlu2 %v2363_v7  ;;  %v2367_v7 = vmov 3  }
  0x98   : > { %v2596_v0 = vpop.permute.xlu2 %1021 }
  0x99   : > { %v1024_v2 = vmul.f32 0.0, %v2596_v0 }
  0x9b   : > { %1030 = vrot.lane.b32.xlu2 %v1024_v2, %s2361_s1  ;;  %v2366_v2 = vmov 20  }
  0xa4   : > { %v2602_v4 = vpop.permute.xlu2 %1137 }
  0xa5   : > { %v1142_v5 = vmul.f32 0.0, %v2602_v4 }
  0xa7   : > { %1150 = vrot.lane.b32.xlu2 %v1142_v5, %s2362_s11 }
  0xad   : > { %v2592_v62 = vpop.permute.xlu0 %2068 }
  0xae   : > { %v2614_v30 = vpop.permute.xlu2 %769 }
  0xaf   : > { %1259 = vperm.xlu2 %2096, %v2547_v15  }
  0xb0   : > { %v717_v39 = vpop.permute.xlu1 %716 }
  0xb5   : > { %v2594_v63 = vpop.permute.xlu0 %1013 }
  0xb7   : > { %2101 = vset.pattern.permute.xlu2 %v2366_v2 }
  0xbd   : > { %v2600_v3 = vpop.permute.xlu0 %2086 }
  0xc3   : > { %v431_v26 = vpop.f32.mrf.mxu1 }
  0xc4   : > { %v405_v25 = vpop.f32.mrf.mxu0  ;;  %v455_v27 = vpop.f32.mrf.mxu2 }
  0xc5   : > { %v432_v35 = vadd.f32 %v431_v26, %v405_v25  ;;  %v2606_v6 = vpop.permute.xlu0 %1075 }
  0xc6   : > { %v479_v28 = vpop.f32.mrf.mxu3 }
  0xc7   : > { %v456_v38 = vadd.f32 %v455_v27, %v432_v35  ;;  %v2616_v35 = vpop.permute.xlu2 %1055 }
  0xc9   : > { %v480_v44 = vadd.f32 %v479_v28, %v456_v38 }
  0xcb   : > { %v525_v34 = vpop.f32.mrf.mxu1 }
  0xcc   : > { %v503_v33 = vpop.f32.mrf.mxu0  ;;  %v551_v36 = vpop.f32.mrf.mxu2 }
  0xcd   : > { %v504_v47 = vadd.f32 %v503_v33, %v480_v44 }
  0xce   : > { %v577_v37 = vpop.f32.mrf.mxu3  ;;  %v2609_v8 = vpop.permute.xlu0 %1109 }
  0xcf   : > { %v578_v41 = vadd.f32 %v577_v37, %v551_v36  ;;  %v2565_v51 = vadd.f32 %v525_v34, %v504_v47  ;;  %v2618_v44 = vpop.permute.xlu2 %1100 }
  0xd1   : > { %v677_v55 = vmul.f32 %v2565_v51, %v2565_v51 }
  0xd3   : > { %v625_v43 = vpop.f32.mrf.mxu1 }
  0xd4   : > { %v601_v42 = vpop.f32.mrf.mxu0  ;;  %v649_v46 = vpop.f32.mrf.mxu2 }
  0xd5   : > { %v602_v45 = vadd.f32 %v601_v42, %v578_v41 }
  0xd6   : > { %v671_v49 = vpop.f32.mrf.mxu3 }
  0xd7   : > { %v626_v48 = vadd.f32 %v625_v43, %v602_v45  ;;  %v2611_v9 = vpop.permute.xlu0 %1171 }
  0xd9   : > { %v650_v50 = vadd.f32 %v649_v46, %v626_v48 }
  0xdb   : > { %v2567_v52 = vadd.f32 %v671_v49, %v650_v50  ;;  %v2365_v50 = vmov 18  }
  0xdd   : > { %v674_v53 = vadd.f32 %v2567_v52, %v2565_v51  ;;  %v678_v54 = vmul.f32 %v2567_v52, %v2567_v52 }
  0xdf   : > { %675 = vadd.xlane.f32.xlu0 %v674_v53  ;;  %v679_v57 = vadd.f32 %v678_v54, %v677_v55  ;;  %v723_v55 = vpop.permute.xlu1 %722 }
  0xe7   : > { %680 = vadd.xlane.f32.xlu0 %v679_v57 }
  0xfb   : > { %1219 = vperm.xlu0 %2095, %v2586_v60  }
 0x103   : > { %2098 = vset.pattern.permute.xlu0 %v2360_v61 }
 0x104   : > { %896 = vperm.xlu0 %2098, %v2547_v15  }
 0x10c   : > { %2099 = vset.pattern.permute.xlu0 %v2365_v50 }
 0x152   : > { %v676_v10 = vpop.xlane.xlu0 %675 }
 0x153   : > { %v682_v11 = vrot.slane %v676_v10, 4 }
 0x155   : > { %v683_v12 = vadd.f32 %v682_v11, %v676_v10 }
 0x157   : > { %v684_v13 = vrot.slane %v683_v12, 2 }
 0x159   : > { %v685_v14 = vadd.f32 %v684_v13, %v683_v12  ;;  %v2368_v12 = vmov 21  }
 0x15a   : > { %v681_v16 = vpop.xlane.xlu0 %680  ;;  %2103 = vset.pattern.permute.xlu1 %v2368_v12 }
 0x15b   : > { %v686_v17 = vrot.slane %v685_v14, 1  ;;  %v689_v18 = vrot.slane %v681_v16, 4 }
 0x15d   : > { %v690_v19 = vadd.f32 %v689_v18, %v681_v16  ;;  %v687_v21 = vadd.f32 %v686_v17, %v685_v14  ;;  %v772_v14 = vmul.f32 0.0, %v2614_v30  ;;  %v2370_v17 = vmov 6  }
 0x15f   : > { %v691_v22 = vrot.slane %v690_v19, 2  ;;  %v688_v24 = vmul.f32 0.00048828125, %v687_v21  ;;  %v2372_v21 = vmov 5  }
 0x161   : > { %v692_v23 = vadd.f32 %v691_v22, %v690_v19  ;;  %v696_v27 = vmul.f32 %v688_v24, %v688_v24  ;;  %v699_v45 = vsub.f32 %v2565_v51, %v688_v24  ;;  %v700_v46 = vsub.f32 %v2567_v52, %v688_v24  ;;  %v2632_v51 = vpop.permute.xlu2 %1129 }
 0x162   : > { %v2371_v19 = vmov 22  }
 0x163   : > { %v693_v25 = vrot.slane %v692_v23, 1 }
 0x165   : > { %v694_v26 = vadd.f32 %v693_v25, %v692_v23  ;;  %v370_v25 = vld [vmem:[#allocation6] sm:$0xf] }
 0x166   : > { %vm377_vm4 = vcmp.gt.f32.partialorder %v370_v25, 0.5 }
 0x167   : > { %v695_v28 = vmul.f32 0.00048828125, %v694_v26 }
 0x169   : > { %v697_v29 = vsub.f32 %v695_v28, %v696_v27  ;;  %v2641_v58 = vpop.permute.xlu2 %1162 }
 0x16b   : > { %v698_v33 = vmax.f32 %v697_v29, 0.0  ;;  %v2735_v29 = vsel %vm377_vm4, 1, %v2349_v31 }
 0x16d   : > { %v701_v34 = vadd.f32 1e-05, %v698_v33  ;;  %v2716_v23 = vpop.permute.xlu0 %1219 }
 0x16f   : > { %2132 = vrsqrt.f32 %v701_v34  ;;  %vm708_vm2 = vweird.f32 %v701_v34 }
 0x171   : > { %v2649_v59 = vpop.permute.xlu2 %1030 }
 0x175   : > { %v2133_v36 = vpop.eup %2132 }
 0x176   : > { %v703_v37 = vmul.f32 %v2133_v36, %v701_v34  ;;  %vm709_vm1 = vweird.f32 %v2133_v36  ;;  %v2730_v28 = vpop.permute.xlu0 %896  ;;  %v791_v34 = vperm.slane %v2735_v29, 1 }
 0x177   : > { %vm710_vm3 = vmor %vm708_vm2, %vm709_vm1 }
 0x178   : > { %v704_v38 = vmul.f32 %v2133_v36, %v703_v37 }
 0x179   : > { %v2658_v5 = vpop.permute.xlu2 %1150 }
 0x17a   : > { %v705_v41 = vmul.f32 0.5, %v704_v38 }
 0x17c   : > { %v706_v42 = vsub.f32 1.5, %v705_v41  ;;  %v737_v41 = vperm.slane %v2735_v29, 0 }
 0x17e   : > { %v707_v43 = vmul.f32 %v2133_v36, %v706_v42 }
 0x180   : > { %v711_v47 = vsel %vm710_vm3, %v2133_v36, %v707_v43  ;;  %v2070_v36 = vunpack.i.l.bf16 %v2592_v62 }
 0x181   : > { %v712_v48 = vmul.f32 %v711_v47, %v699_v45  ;;  %v713_v49 = vmul.f32 %v711_v47, %v700_v46  ;;  %v2669_v10 = vpop.permute.xlu2 %1259  ;;  %v2757_v46 = vperm.slane %v737_v41, 0 }
 0x182   : > { %v1262_v11 = vmul.f32 0.0, %v2669_v10 }
 0x183   : > { %v719_v53 = vmul.f32 %v717_v39, %v712_v48  ;;  %v720_v54 = vmul.f32 %v717_v39, %v713_v49  ;;  %v2071_v48 = vunpack.i.h.bf16 %v2592_v62  ;;  %vm741_vm8 = vcmp.eq.s32.totalorder %v2757_v46, 1 }
 0x185   : > { %v2622_v56 = vadd.f32 %v723_v55, %v719_v53  ;;  %v2624_v57 = vadd.f32 %v723_v55, %v720_v54 }
 0x187   : > { %750 = vrot.lane.b32.xlu2 %v2624_v57, %s2343_s5  ;;  %1158 = vrot.lane.b32.xlu0 %v2622_v56, %s2359_s21  ;;  %v1025_v52 = vmul.f32 %v2596_v0, %v2622_v56  ;;  %v1140_v61 = vmul.f32 %v2602_v4, %v2622_v56  ;;  %v1026_v13 = vmul.f32 %v2596_v0, %v2624_v57  ;;  %v2369_v0 = vmov 4  }
 0x188   : > { %748 = vrot.lane.b32.xlu1 %v2622_v56, %s2343_s5  ;;  %v1141_v33 = vmul.f32 %v2602_v4, %v2624_v57  ;;  %v2753_v4 = vperm.slane %v791_v34, 1  ;;  %v773_v45 = vmul.f32 %v2614_v30, %v2622_v56 }
 0x18a   : > { %vm795_vm7 = vcmp.eq.s32.totalorder %v2753_v4, 1 }
 0x18f   : > { %1004 = vrot.lane.b32.xlu2 %v2624_v57, %s2343_s5  ;;  %1032 = vrot.lane.b32.xlu0 %v1025_v52, %s2361_s1 }
 0x190   : > { %1002 = vrot.lane.b32.xlu1 %v2622_v56, %s2343_s5 }
 0x197   : > { %1044 = vrot.lane.b32.xlu2 %v2622_v56, %s2353_s22  ;;  %1238 = vrot.lane.b32.xlu0 %v2342_v1, %s2343_s5 }
 0x198   : > { %1046 = vrot.lane.b32.xlu1 %v2624_v57, %s2353_s22 }
 0x19f   : > { %1066 = vrot.lane.b32.xlu2 %v2624_v57, %s2344_s17  ;;  %1146 = vrot.lane.b32.xlu0 %v1140_v61, %s2362_s11 }
 0x1a0   : > { %1064 = vrot.lane.b32.xlu1 %v2622_v56, %s2344_s17 }
 0x1a7   : > { %1096 = vrot.lane.b32.xlu2 %v2622_v56, %s2356_s25  ;;  %1251 = vperm.xlu0 %2099, %v2547_v15  }
 0x1a8   : > { %1098 = vrot.lane.b32.xlu1 %v2624_v57, %s2356_s25 }
 0x1af   : > { %1118 = vrot.lane.b32.xlu2 %v2624_v57, %s2358_s24  ;;  %2100 = vset.pattern.permute.xlu0 %v2367_v7 }
 0x1b0   : > { %1116 = vrot.lane.b32.xlu1 %v2622_v56, %s2358_s24  ;;  %1225 = vperm.xlu0 %2100, %v2586_v60   ;;  %v2689_v60 = vpop.permute.xlu1 %761 }
 0x1b7   : > { %1268 = vrot.lane.b32.xlu2 %v1262_v11, %s2361_s1 }
 0x1b8   : > { %1160 = vrot.lane.b32.xlu1 %v2624_v57, %s2359_s21  ;;  %801 = vrot.lane.b32.xlu0 %v2624_v57, %s2353_s22  ;;  %v2698_v16 = vpop.permute.xlu1 %2080 }
 0x1b9   : > { %v2082_v47 = vunpack.i.l.bf16 %v2698_v16 }
 0x1bf   : > { %797 = vrot.lane.b32.xlu2 %v2342_v1, %s2353_s22 }
 0x1c0   : > { %1034 = vrot.lane.b32.xlu1 %v1026_v13, %s2361_s1  ;;  %820 = vrot.lane.b32.xlu0 %v2622_v56, %s2344_s17  ;;  %v2704_v18 = vpop.permute.xlu1 %1083 }
 0x1c1   : > { %v1086_v41 = vmul.f32 %v2704_v18, %v2622_v56 }
 0x1c7   : > { %1293 = vperm.xlu2 %2101, %v2547_v15  }
 0x1c8   : > { %799 = vrot.lane.b32.xlu1 %v2622_v56, %s2353_s22  ;;  %832 = vperm.xlu0 %2100, %v2547_v15   ;;  %v2713_v22 = vpop.permute.xlu1 %1120 }
 0x1cf   : > { %778 = vrot.lane.b32.xlu2 %v772_v14, %s2361_s1 }
 0x1d0   : > { %818 = vrot.lane.b32.xlu1 %v2342_v1, %s2344_s17  ;;  %2102 = vset.pattern.permute.xlu2 %v2350_v32  ;;  %v774_v32 = vmul.f32 %v2614_v30, %v2624_v57  ;;  %v2726_v26 = vpop.permute.xlu1 %1375 }
 0x1d1   : > { %2110 = vset.pattern.permute.xlu0 %v2369_v0 }
 0x1d2   : > { %840 = vperm.xlu0 %2110, %v2547_v15  }
 0x1d7   : > { %811 = vperm.xlu2 %2102, %v2547_v15  }
 0x1d8   : > { %1313 = vperm.xlu1 %2103, %v2547_v15  }
 0x1da   : > { %874 = vrot.lane.b32.xlu0 %v2622_v56, %s2358_s24 }
 0x1db   : > { %2119 = vset.pattern.permute.xlu0 %v2370_v17  ;;  %v2088_v17 = vunpack.i.l.bf16 %v2600_v3 }
 0x1df   : > { %822 = vrot.lane.b32.xlu2 %v2624_v57, %s2344_s17 }
 0x1e0   : > { %2106 = vrot.lane.b32.xlu1 %v2342_v1, %s2356_s25  ;;  %2104 = vset.pattern.permute.xlu2 %v2371_v19 }
 0x1e1   : > { %v751_v20 = vpop.permute.xlu2 %750  ;;  %2117 = vset.pattern.permute.xlu1 %v2372_v21 }
 0x1e2   : > { %782 = vrot.lane.b32.xlu0 %v774_v32, %s2361_s1 }
 0x1e7   : > { %1321 = vperm.xlu2 %2104, %v2547_v15  }
 0x1e8   : > { %855 = vrot.lane.b32.xlu1 %v2624_v57, %s2356_s25 }
 0x1e9   : > { %v2720_v24 = vpop.permute.xlu2 %1004 }
 0x1ea   : > { %888 = vperm.xlu0 %2119, %v2547_v15  }
 0x1ef   : > { %853 = vrot.lane.b32.xlu2 %v2622_v56, %s2356_s25 }
 0x1f0   : > { %867 = vperm.xlu1 %2117, %v2547_v15  }
 0x1f1   : > { %v2728_v27 = vpop.permute.xlu2 %1044 }
 0x1f2   : > { %920 = vrot.lane.b32.xlu0 %v2624_v57, %s2359_s21  ;;  %v1048_v49 = vsel %vm803_vm6, %v2082_v47, %v2728_v27 }
 0x1f3   : > { %2129 = vset.pattern.permute.xlu0 %v2372_v21  ;;  %v1052_v55 = vsel %vm795_vm7, %v1048_v49, 0.0 }
 0x1f4   : > { %v1058_v2 = vmul.f32 %v2616_v35, %v1052_v55 }
 0x1f8   : > { %1148 = vrot.lane.b32.xlu1 %v1141_v33, %s2362_s11 }
 0x1f9   : > { %v2742_v37 = vpop.permute.xlu2 %1066  ;;  %v2744_v39 = vpop.permute.xlu0 %1158 }
 0x1fa   : > { %v749_v38 = vpop.permute.xlu1 %748 }
 0x1fb   : > { %v2748_v42 = vsel %vm752_vm5, %v2070_v36, %v749_v38  ;;  %v2751_v43 = vsel %vm752_vm5, %v749_v38, %v751_v20 }
 0x200   : > { %780 = vrot.lane.b32.xlu1 %v773_v45, %s2361_s1 }
 0x201   : > { %v1097_v50 = vpop.permute.xlu2 %1096  ;;  %v2765_v54 = vpop.permute.xlu0 %1032 }
 0x202   : > { %v1003_v53 = vpop.permute.xlu1 %1002  ;;  %v1036_v61 = vsel %vm784_vm9, %v2649_v59, %v2765_v54 }
 0x203   : > { %v1006_v30 = vsel %vm752_vm5, %v2071_v48, %v1003_v53 }
 0x204   : > { %v1010_v52 = vsel %vm741_vm8, %v1006_v30, 0.0  ;;  %v2373_v30 = vmov 23  }
 0x205   : > { %v1016_v62 = vmul.f32 %v2594_v63, %v1010_v52  ;;  %2111 = vset.pattern.permute.xlu2 %v2373_v30 }
 0x206   : > { %1347 = vperm.xlu2 %2111, %v2547_v15  }
 0x207   : > { %v1040_v7 = vadd.f32 %v1036_v61, %v1016_v62 }
 0x209   : > { %v1060_v11 = vadd.f32 %v1058_v2, %v1040_v7  ;;  %v1119_v12 = vpop.permute.xlu2 %1118  ;;  %v2778_v14 = vpop.permute.xlu0 %1238 }
 0x20a   : > { %v1047_v13 = vpop.permute.xlu1 %1046 }
 0x20e   : > { %2113 = vrot.lane.b32.xlu2 %v2342_v1, %s2358_s24 }
 0x211   : > { %v2781_v32 = vpop.permute.xlu2 %1268  ;;  %v2783_v20 = vpop.permute.xlu0 %1146 }
 0x212   : > { %v1065_v19 = vpop.permute.xlu1 %1064 }
 0x213   : > { %v1068_v21 = vsel %vm824_vm10, %v2088_v17, %v1065_v19  ;;  %v792_v17 = vperm.slane %v2735_v29, 3 }
 0x214   : > { %v1072_v59 = vsel %vm741_vm8, %v1068_v21, 0.0 }
 0x215   : > { %v1078_v25 = vmul.f32 %v2606_v6, %v1072_v59 }
 0x217   : > { %v1080_v33 = vadd.f32 %v1078_v25, %v1060_v11  ;;  %v738_v11 = vperm.slane %v2735_v29, 2  ;;  %v1049_v29 = vsel %vm803_vm6, %v2728_v27, %v1047_v13 }
 0x219   : > { %v798_v34 = vpop.permute.xlu2 %797  ;;  %v2789_v38 = vpop.permute.xlu0 %1251  ;;  %v1088_v48 = vadd.f32 %v1086_v41, %v1080_v33  ;;  %v2812_v25 = vperm.slane %v738_v11, 0  ;;  %v2814_v33 = vperm.slane %v792_v17, 1  ;;  %v1087_v17 = vmul.f32 %v2704_v18, %v2624_v57 }
 0x21a   : > { %v1099_v36 = vpop.permute.xlu1 %1098 }
 0x21b   : > { %v1102_v45 = vsel %vm859_vm11, %v1097_v50, %v1099_v36  ;;  %vm742_vm13 = vcmp.eq.s32.totalorder %v2812_v25, 1  ;;  %vm796_vm14 = vcmp.eq.s32.totalorder %v2814_v33, 1 }
 0x21c   : > { %v1106_v47 = vsel %vm795_vm7, %v1102_v45, 0.0  ;;  %v1053_v30 = vsel %vm796_vm14, %v1049_v29, 0.0 }
 0x21d   : > { %v1112_v49 = vmul.f32 %v2609_v8, %v1106_v47  ;;  %v1007_v47 = vsel %vm752_vm5, %v1003_v53, %v2720_v24  ;;  %v1059_v13 = vmul.f32 %v2616_v35, %v1053_v30 }
 0x21f   : > { %v1114_v55 = vadd.f32 %v1112_v49, %v1088_v48  ;;  %v1011_v48 = vsel %vm742_vm13, %v1007_v47, 0.0  ;;  %v1069_v49 = vsel %vm824_vm10, %v1065_v19, %v2742_v37  ;;  %v1123_v19 = vsel %vm880_vm12, %v1119_v12, %v2713_v22 }
 0x220   : > { %v1017_v53 = vmul.f32 %v2594_v63, %v1011_v48 }
 0x221   : > { %v2798_v52 = vpop.permute.xlu2 %1293 }
 0x222   : > { %v1117_v62 = vpop.permute.xlu1 %1116  ;;  %v2801_v2 = vpop.permute.xlu0 %1225 }
 0x223   : > { %v1122_v61 = vsel %vm880_vm12, %v1117_v62, %v1119_v12  ;;  %v1073_v62 = vsel %vm742_vm13, %v1069_v49, 0.0 }
 0x224   : > { %v1126_v50 = vsel %vm741_vm8, %v1122_v61, 0.0 }
 0x225   : > { %v1132_v7 = vmul.f32 %v2632_v51, %v1126_v50  ;;  %v1103_v50 = vsel %vm859_vm11, %v1099_v36, %v2618_v44 }
 0x226   : > { %v1107_v11 = vsel %vm796_vm14, %v1103_v50, 0.0 }
 0x227   : > { %v2808_v21 = vadd.f32 %v1132_v7, %v1114_v55  ;;  %v1079_v7 = vmul.f32 %v2606_v6, %v1073_v62  ;;  %v1113_v44 = vmul.f32 %v2609_v8, %v1107_v11  ;;  %v2374_v11 = vmov 24  }
 0x228   : > { %2118 = vset.pattern.permute.xlu1 %v2374_v11 }
 0x229   : > { %v2810_v59 = vpop.permute.xlu2 %778 }
 0x22a   : > { %v2816_v41 = vpop.permute.xlu1 %1160  ;;  %v802_v45 = vpop.permute.xlu0 %801 }
 0x231   : > { %v812_v24 = vpop.permute.xlu2 %811 }
 0x232   : > { %v1035_v55 = vpop.permute.xlu1 %1034  ;;  %v821_v27 = vpop.permute.xlu0 %820 }
 0x233   : > { %v1037_v61 = vsel %vm784_vm9, %v2765_v54, %v1035_v55  ;;  %v1127_v54 = vsel %vm742_vm13, %v1123_v19, 0.0 }
 0x234   : > { %v1041_v37 = vadd.f32 %v1037_v61, %v1017_v53  ;;  %v1133_v6 = vmul.f32 %v2632_v51, %v1127_v54 }
 0x236   : > { %v1061_v63 = vadd.f32 %v1059_v13, %v1041_v37 }
 0x238   : > { %v1081_v35 = vadd.f32 %v1079_v7, %v1061_v63 }
 0x239   : > { %v823_v47 = vpop.permute.xlu2 %822 }
 0x23a   : > { %v826_v36 = vsel %vm824_vm10, %v821_v27, %v823_v47  ;;  %v800_v29 = vpop.permute.xlu1 %799  ;;  %v1089_v22 = vadd.f32 %v1087_v17, %v1081_v35  ;;  %v833_v49 = vpop.permute.xlu0 %832 }
 0x23b   : > { %v804_v12 = vsel %vm803_vm6, %v798_v34, %v800_v29  ;;  %v805_v48 = vsel %vm803_vm6, %v800_v29, %v802_v45  ;;  %v830_v18 = vsel %vm742_vm13, %v826_v36, 0.0 }
 0x23c   : > { %v808_v30 = vsel %vm795_vm7, %v804_v12, 0.0  ;;  %v809_v8 = vsel %vm796_vm14, %v805_v48, 0.0  ;;  %v836_v53 = vmul.f32 %v833_v49, %v830_v18  ;;  %v1115_v55 = vadd.f32 %v1113_v44, %v1089_v22 }
 0x23d   : > { %v814_v62 = vmul.f32 %v812_v24, %v808_v30  ;;  %v815_v61 = vmul.f32 %v812_v24, %v809_v8  ;;  %v1165_v12 = vsel %vm924_vm15, %v2816_v41, %v2641_v58 }
 0x23e   : > { %v1135_v13 = vadd.f32 %v1133_v6, %v1115_v55  ;;  %v1164_v6 = vsel %vm924_vm15, %v2744_v39, %v2816_v41 }
 0x23f   : > { %v1168_v18 = vsel %vm795_vm7, %v1164_v6, 0.0 }
 0x240   : > { %v1174_v55 = vmul.f32 %v2611_v9, %v1168_v18 }
 0x241   : > { %v2865_v19 = vpop.permute.xlu2 %1321 }
 0x242   : > { %v819_v51 = vpop.permute.xlu1 %818 }
 0x243   : > { %v825_v34 = vsel %vm824_vm10, %v819_v51, %v821_v27 }
 0x244   : > { %v829_v45 = vsel %vm741_vm8, %v825_v34, 0.0  ;;  %v841_v35 = vpop.permute.xlu0 %840 }
 0x245   : > { %v835_v50 = vmul.f32 %v833_v49, %v829_v45  ;;  %v1169_v49 = vsel %vm796_vm14, %v1165_v12, 0.0  ;;  %v843_v6 = vmul.f32 %v841_v35, %v2622_v56  ;;  %v844_v12 = vmul.f32 %v841_v35, %v2624_v57 }
 0x246   : > { %v1175_v58 = vmul.f32 %v2611_v9, %v1169_v49 }
 0x249   : > { %v854_v17 = vpop.permute.xlu2 %853 }
 0x24a   : > { %v2863_v37 = vpop.permute.xlu1 %1313 }
 0x24c   : > { %v2882_v48 = vpop.permute.xlu0 %874 }
 0x252   : > { %v2867_v7 = vpop.permute.xlu1 %2106 }
 0x253   : > { %v2109_v63 = vunpack.i.h.bf16 %v2867_v7 }
 0x25a   : > { %v856_v24 = vpop.permute.xlu1 %855 }
 0x25b   : > { %v860_v54 = vsel %vm859_vm11, %v854_v17, %v856_v24  ;;  %v861_v27 = vsel %vm859_vm11, %v856_v24, %v2109_v63  ;;  %v757_v63 = vsel %vm741_vm8, %v2748_v42, 0.0  ;;  %v783_v17 = vpop.permute.xlu0 %782 }
 0x25c   : > { %v864_v47 = vsel %vm795_vm7, %v860_v54, 0.0  ;;  %v865_v36 = vsel %vm796_vm14, %v861_v27, 0.0 }
 0x262   : > { %v868_v44 = vpop.permute.xlu1 %867 }
 0x263   : > { %v870_v29 = vmul.f32 %v868_v44, %v864_v47  ;;  %v871_v22 = vmul.f32 %v868_v44, %v865_v36 }
 0x26a   : > { %v1149_v30 = vpop.permute.xlu1 %1148 }
 0x26b   : > { %v1152_v8 = vsel %vm911_vm0, %v2783_v20, %v1149_v30  ;;  %v1153_v39 = vsel %vm911_vm0, %v1149_v30, %v2658_v5  ;;  %v758_v20 = vsel %vm742_vm13, %v2751_v43, 0.0 }
 0x26c   : > { %v1156_v41 = vadd.f32 %v1152_v8, %v2808_v21  ;;  %v1157_v51 = vadd.f32 %v1153_v39, %v1135_v13  ;;  %v764_v13 = vmul.f32 %v2689_v60, %v757_v63  ;;  %v765_v11 = vmul.f32 %v2689_v60, %v758_v20 }
 0x26e   : > { %v2895_v34 = vadd.f32 %v1174_v55, %v1156_v41  ;;  %v2897_v45 = vadd.f32 %v1175_v58, %v1157_v51 }
 0x270   : > { %v1178_v5 = vadd.f32 %v2897_v45, %v2895_v34  ;;  %v1181_v9 = vmul.f32 %v2895_v34, %v2895_v34  ;;  %v1182_v21 = vmul.f32 %v2897_v45, %v2897_v45 }
 0x272   : > { %v781_v24 = vpop.permute.xlu1 %780  ;;  %1179 = vadd.xlane.f32.xlu1 %v1178_v5  ;;  %v1183_v42 = vadd.f32 %v1182_v21, %v1181_v9 }
 0x273   : > { %v785_v43 = vsel %vm784_vm9, %v2810_v59, %v781_v24  ;;  %v786_v54 = vsel %vm784_vm9, %v781_v24, %v783_v17  ;;  %v899_v59 = vmul.f32 %v2730_v28, %v2622_v56 }
 0x274   : > { %v789_v27 = vadd.f32 %v785_v43, %v764_v13  ;;  %v790_v47 = vadd.f32 %v786_v54, %v765_v11  ;;  %1184 = vadd.xlane.f32.xlu2 %v1183_v42 }
 0x276   : > { %v816_v44 = vadd.f32 %v814_v62, %v789_v27  ;;  %v817_v36 = vadd.f32 %v815_v61, %v790_v47  ;;  %v2934_v62 = vpop.permute.xlu2 %1347 }
 0x278   : > { %v837_v18 = vadd.f32 %v835_v50, %v816_v44  ;;  %v838_v60 = vadd.f32 %v836_v53, %v817_v36  ;;  %v1380_v53 = vmul.f32 0.0, %v2726_v26 }
 0x27a   : > { %v845_v49 = vadd.f32 %v843_v6, %v837_v18  ;;  %v846_v30 = vadd.f32 %v844_v12, %v838_v60 }
 0x27c   : > { %v2918_v8 = vadd.f32 %v870_v29, %v845_v49  ;;  %v2920_v39 = vadd.f32 %v871_v22, %v846_v30 }
 0x27e   : > { %v2936_v61 = vpop.permute.xlu2 %2113 }
 0x28b   : > { %1367 = vperm.xlu1 %2118, %v2547_v15  }
 0x28c   : > { %876 = vrot.lane.b32.xlu2 %v2624_v57, %s2358_s24 }
 0x293   : > { %918 = vrot.lane.b32.xlu1 %v2622_v56, %s2359_s21  ;;  %v2375_v56 = vmov 26  }
 0x294   : > { %2121 = vrot.lane.b32.xlu2 %v2342_v1, %s2359_s21 }
 0x295   : > { %2125 = vset.pattern.permute.xlu2 %v2375_v56 }
 0x29b   : > { %905 = vrot.lane.b32.xlu1 %v899_v59, %s2362_s11 }
 0x29c   : > { %1388 = vrot.lane.b32.xlu2 %v1380_v53, %s2362_s11 }
 0x2a4   : > { %1409 = vperm.xlu2 %2125, %v2547_v15  }
 0x2ac   : > { %2127 = vset.pattern.permute.xlu2 %v2369_v0 }
 0x2e5   : > { %v1180_v50 = vpop.xlane.xlu1 %1179 }
 0x2e6   : > { %v1186_v35 = vrot.slane %v1180_v50, 4 }
 0x2e7   : > { %v1185_v29 = vpop.xlane.xlu2 %1184 }
 0x2e8   : > { %v1187_v22 = vadd.f32 %v1186_v35, %v1180_v50  ;;  %v1193_v55 = vrot.slane %v1185_v29, 4  ;;  %v901_v50 = vmul.f32 0.0, %v2730_v28 }
 0x2ea   : > { %v1188_v58 = vrot.slane %v1187_v22, 2  ;;  %v1194_v1 = vadd.f32 %v1193_v55, %v1185_v29 }
 0x2ec   : > { %v1189_v41 = vadd.f32 %v1188_v58, %v1187_v22  ;;  %v1195_v51 = vrot.slane %v1194_v1, 2  ;;  %v2997_v22 = vpop.permute.xlu0 %888 }
 0x2ee   : > { %v1190_v63 = vrot.slane %v1189_v41, 1  ;;  %v1196_v20 = vadd.f32 %v1195_v51, %v1194_v1 }
 0x2ef   : > { %v877_v55 = vpop.permute.xlu2 %876 }
 0x2f0   : > { %v1191_v5 = vadd.f32 %v1190_v63, %v1189_v41  ;;  %v1197_v9 = vrot.slane %v1196_v20, 1 }
 0x2f2   : > { %v1192_v21 = vmul.f32 0.00048828125, %v1191_v5  ;;  %v1198_v13 = vadd.f32 %v1197_v9, %v1196_v20 }
 0x2f4   : > { %v1199_v11 = vmul.f32 0.00048828125, %v1198_v13  ;;  %v1200_v17 = vmul.f32 %v1192_v21, %v1192_v21  ;;  %v1203_v6 = vsub.f32 %v2895_v34, %v1192_v21  ;;  %v1204_v12 = vsub.f32 %v2897_v45, %v1192_v21  ;;  %v3001_v58 = vpop.permute.xlu0 %920 }
 0x2f5   : > { %v2376_v34 = vmov 8   ;;  %v900_v45 = vmul.f32 %v2730_v28, %v2624_v57  ;;  %v2140_v28 = vld [vmem:[%s3197_s4] sm:$0xff] }
 0x2f6   : > { %v1201_v24 = vsub.f32 %v1199_v11, %v1200_v17  ;;  %2126 = vset.pattern.permute.xlu1 %v2376_v34  ;;  %v881_v11 = vsel %vm880_vm12, %v2882_v48, %v877_v55  ;;  %v2116_v34 = vunpack.i.h.bf16 %v2936_v61 }
 0x2f7   : > { %v3003_v1 = vpop.permute.xlu2 %2121 }
 0x2f8   : > { %v1202_v42 = vmax.f32 %v1201_v24, 0.0 }
 0x2fa   : > { %v1205_v43 = vadd.f32 1e-05, %v1202_v42  ;;  %v885_v42 = vsel %vm741_vm8, %v881_v11, 0.0 }
 0x2fc   : > { %2134 = vrsqrt.f32 %v1205_v43  ;;  %vm1212_vm2 = vweird.f32 %v1205_v43 }
 0x2fd   : > { %v2995_v29 = vpop.permute.xlu1 %1367 }
 0x2ff   : > { %v3005_v56 = vpop.permute.xlu2 %1388 }
 0x302   : > { %v2135_v54 = vpop.eup %2134 }
 0x303   : > { %v1207_v27 = vmul.f32 %v2135_v54, %v1205_v43  ;;  %vm1213_vm1 = vweird.f32 %v2135_v54  ;;  %v891_v43 = vmul.f32 %v2997_v22, %v885_v42 }
 0x304   : > { %vm1214_vm3 = vmor %vm1212_vm2, %vm1213_vm1 }
 0x305   : > { %v1208_v47 = vmul.f32 %v2135_v54, %v1207_v27 }
 0x307   : > { %v1209_v44 = vmul.f32 0.5, %v1208_v47  ;;  %v3007_v5 = vpop.permute.xlu2 %1409  ;;  %v893_v47 = vadd.f32 %v891_v43, %v2918_v8 }
 0x309   : > { %v1210_v36 = vsub.f32 1.5, %v1209_v44 }
 0x30b   : > { %v1211_v15 = vmul.f32 %v2135_v54, %v1210_v36 }
 0x30d   : > { %v1215_v18 = vsel %vm1214_vm3, %v2135_v54, %v1211_v15 }
 0x30e   : > { %v1216_v60 = vmul.f32 %v1215_v18, %v1203_v6  ;;  %v1217_v0 = vmul.f32 %v1215_v18, %v1204_v12  ;;  %v2083_v18 = vunpack.i.h.bf16 %v2698_v16  ;;  %v2108_v16 = vunpack.i.l.bf16 %v2867_v7 }
 0x310   : > { %v1222_v49 = vmul.f32 %v2716_v23, %v1216_v60  ;;  %v1223_v30 = vmul.f32 %v2716_v23, %v1217_v0  ;;  %v2089_v0 = vunpack.i.h.bf16 %v2600_v3  ;;  %v2115_v3 = vunpack.i.l.bf16 %v2936_v61 }
 0x311   : > { %v882_v61 = vsel %vm880_vm12, %v877_v55, %v2116_v34 }
 0x312   : > { %v2945_v59 = vadd.f32 %v2801_v2, %v1222_v49  ;;  %v2948_v53 = vadd.f32 %v2801_v2, %v1223_v30 }
 0x314   : > { %1304 = vrot.lane.b32.xlu0 %v2948_v53, %s2344_s17  ;;  %1242 = vrot.lane.b32.xlu1 %v2948_v53, %s2343_s5  ;;  %v1264_v23 = vmul.f32 %v2669_v10, %v2948_v53  ;;  %v1379_v2 = vmul.f32 %v2726_v26, %v2948_v53  ;;  %v1263_v35 = vmul.f32 %v2669_v10, %v2945_v59  ;;  %v2999_v10 = vpop.permute.xlu1 %918 }
 0x315   : > { %1240 = vrot.lane.b32.xlu2 %v2945_v59, %s2343_s5  ;;  %v1378_v57 = vmul.f32 %v2726_v26, %v2945_v59 }
 0x31c   : > { %1356 = vrot.lane.b32.xlu0 %v2948_v53, %s2358_s24  ;;  %1284 = vrot.lane.b32.xlu1 %v2948_v53, %s2353_s22  ;;  %v906_v26 = vpop.permute.xlu1 %905 }
 0x31d   : > { %1282 = vrot.lane.b32.xlu2 %v2945_v59, %s2353_s22 }
 0x324   : > { %1272 = vrot.lane.b32.xlu0 %v1264_v23, %s2361_s1  ;;  %1302 = vrot.lane.b32.xlu1 %v2945_v59, %s2344_s17  ;;  %s367_s17 = scalar_lea.vmem [#allocation11], %s1942_s10  ;;  %s1817_s10 = scalar_lea.sflag [#allocation5], %s2521_s18 }
 0x325   : > { %1336 = vrot.lane.b32.xlu2 %v2948_v53, %s2356_s25 }
 0x32c   : > { %1386 = vrot.lane.b32.xlu0 %v1379_v2, %s2362_s11  ;;  %1334 = vrot.lane.b32.xlu1 %v2945_v59, %s2356_s25  ;;  %s1828_s25 = scalar_lea.hbm %s3201_s8, %s1953_s19 }
 0x32d   : > { %1396 = vrot.lane.b32.xlu2 %v2945_v59, %s2359_s21 }
 0x334   : > { %907 = vrot.lane.b32.xlu0 %v900_v45, %s2362_s11  ;;  %1354 = vrot.lane.b32.xlu1 %v2945_v59, %s2358_s24  ;;  %s1830_s24 = sshll.u32 %s367_s17, 4  ;;  %s1831_s24 = int_to_ptr.vmem [resolvable:$true] %s1830_s24 }
 0x335   : > { %909 = vrot.lane.b32.xlu2 %v901_v50, %s2362_s11 }
 0x33c   : > { %1398 = vrot.lane.b32.xlu1 %v2948_v53, %s2359_s21  ;;  %s1832_s21 = sshll.u32 %s1828_s25, 4  ;;  %s1833_s21 = int_to_ptr.hbm [resolvable:$true] %s1832_s21 }
 0x344   : > { %1270 = vrot.lane.b32.xlu1 %v1263_v35, %s2361_s1  ;;  %s2276_s1 = sshra.s32 %s1833_s21, 4  ;;  %s2277_s1 = int_to_ptr.hbm [resolvable:$true] %s2276_s1 }
 0x345   : > { %s2278_s9 = scalar_lea.hbm %s2277_s1, 16  ;;  %p2283_p9 = scmp.lt.s32.totalorder %s2277_s1, %s3201_s8 }
 0x346   : > { %p2279_p1 = scmp.ne.s32.totalorder %s2277_s1, %s2278_s9  ;;  %p2284_p10 = scmp.lt.s32.totalorder %s2282_s16, %s2278_s9 }
 0x348   : > { %p2280_p4 = pnand %p2279_p1, %p2494_p3  ;;  %p2285_p2 = por %p2284_p10, %p2283_p9 }
 0x34a   : > { %p2281_p8 = pneg %p2280_p4 }
 0x34c   : > { %1384 = vrot.lane.b32.xlu1 %v1378_v57, %s2362_s11  ;;  %p2286_p11 = pnand %p2285_p2, %p2281_p8 }
 0x354   : > { %932 = vperm.xlu1 %2126, %v2140_v28  }
 0x35c   : > { %2128 = vset.pattern.permute.xlu1 %v2349_v31 }
 0x36f   : > { %v1241_v13 = vpop.permute.xlu2 %1240 }
 0x370   : > { %v1244_v12 = vsel %vm752_vm5, %v2778_v14, %v1241_v13 }
 0x371   : > { %v1248_v8 = vsel %vm741_vm8, %v1244_v12, 0.0  ;;  %v2124_v12 = vunpack.i.h.bf16 %v3003_v1 }
 0x372   : > { %v1254_v45 = vmul.f32 %v2789_v38, %v1248_v8 }
 0x377   : > { %v1283_v54 = vpop.permute.xlu2 %1282 }
 0x378   : > { %v1286_v49 = vsel %vm803_vm6, %v2083_v18, %v1283_v54  ;;  %v2123_v18 = vunpack.i.l.bf16 %v3003_v1 }
 0x379   : > { %v1290_v50 = vsel %vm795_vm7, %v1286_v49, 0.0 }
 0x37f   : > { %v1337_v48 = vpop.permute.xlu2 %1336 }
 0x380   : > { %v1341_v57 = vsel %vm859_vm11, %v1337_v48, %v2108_v16 }
 0x386   : > { %v1243_v41 = vpop.permute.xlu1 %1242  ;;  %v1305_v51 = vpop.permute.xlu0 %1304 }
 0x387   : > { %v1245_v60 = vsel %vm752_vm5, %v1241_v13, %v1243_v41  ;;  %v1296_v13 = vmul.f32 %v2798_v52, %v1290_v50  ;;  %v1397_v11 = vpop.permute.xlu2 %1396 }
 0x388   : > { %v1249_v23 = vsel %vm742_vm13, %v1245_v60, 0.0  ;;  %v1325_v60 = vmul.f32 %v2865_v19, %v2948_v53 }
 0x389   : > { %v1255_v28 = vmul.f32 %v2789_v38, %v1249_v23 }
 0x38e   : > { %v1285_v63 = vpop.permute.xlu1 %1284  ;;  %v1357_v20 = vpop.permute.xlu0 %1356 }
 0x38f   : > { %v1287_v30 = vsel %vm803_vm6, %v1283_v54, %v1285_v63  ;;  %v1345_v54 = vsel %vm796_vm14, %v1341_v57, 0.0 }
 0x390   : > { %v1291_v35 = vsel %vm796_vm14, %v1287_v30, 0.0  ;;  %v1351_v49 = vmul.f32 %v2934_v62, %v1345_v54 }
 0x391   : > { %v1297_v38 = vmul.f32 %v2798_v52, %v1291_v35  ;;  %v886_v52 = vsel %vm742_vm13, %v882_v61, 0.0 }
 0x392   : > { %v892_v25 = vmul.f32 %v2997_v22, %v886_v52 }
 0x394   : > { %v894_v61 = vadd.f32 %v892_v25, %v2920_v39 }
 0x396   : > { %v1303_v9 = vpop.permute.xlu1 %1302  ;;  %v1273_v21 = vpop.permute.xlu0 %1272 }
 0x397   : > { %v1306_v2 = vsel %vm824_vm10, %v2089_v0, %v1303_v9  ;;  %v1307_v14 = vsel %vm824_vm10, %v1303_v9, %v1305_v51 }
 0x398   : > { %v1311_v7 = vsel %vm742_vm13, %v1307_v14, 0.0 }
 0x39e   : > { %v1335_v17 = vpop.permute.xlu1 %1334  ;;  %v3011_v24 = vpop.permute.xlu0 %1386 }
 0x39f   : > { %v1340_v51 = vsel %vm859_vm11, %v1335_v17, %v1337_v48  ;;  %v1317_v17 = vmul.f32 %v2863_v37, %v1311_v7  ;;  %v1391_v22 = vsel %vm911_vm0, %v3011_v24, %v3005_v56 }
 0x3a6   : > { %v1355_v27 = vpop.permute.xlu1 %1354  ;;  %v3017_v44 = vpop.permute.xlu0 %907 }
 0x3a7   : > { %v912_v36 = vsel %vm911_vm0, %v906_v26, %v3017_v44  ;;  %v1310_v26 = vsel %vm741_vm8, %v1306_v2, 0.0 }
 0x3a8   : > { %v3021_v15 = vadd.f32 %v912_v36, %v893_v47  ;;  %v1361_v47 = vsel %vm880_vm12, %v1357_v20, %v2115_v3  ;;  %v1316_v55 = vmul.f32 %v2863_v37, %v1310_v26  ;;  %v1324_v37 = vmul.f32 %v2865_v19, %v2945_v59  ;;  %v910_v3 = vpop.permute.xlu2 %909 }
 0x3a9   : > { %v913_v35 = vsel %vm911_vm0, %v3017_v44, %v910_v3 }
 0x3ae   : > { %v1399_v6 = vpop.permute.xlu1 %1398 }
 0x3af   : > { %v1402_v1 = vsel %vm924_vm15, %v1397_v11, %v1399_v6  ;;  %v1403_v23 = vsel %vm924_vm15, %v1399_v6, %v2123_v18  ;;  %v926_v6 = vsel %vm924_vm15, %v3001_v58, %v2124_v12 }
 0x3b0   : > { %v1407_v46 = vsel %vm796_vm14, %v1403_v23, 0.0  ;;  %v930_v56 = vsel %vm796_vm14, %v926_v6, 0.0 }
 0x3b1   : > { %v1413_v26 = vmul.f32 %v3007_v5, %v1407_v46 }
 0x3b6   : > { %v1271_v41 = vpop.permute.xlu1 %1270 }
 0x3b7   : > { %v1274_v63 = vsel %vm784_vm9, %v2781_v32, %v1271_v41  ;;  %v1275_v9 = vsel %vm784_vm9, %v1271_v41, %v1273_v21  ;;  %v1344_v32 = vsel %vm795_vm7, %v1340_v51, 0.0  ;;  %v1360_v21 = vsel %vm880_vm12, %v1355_v27, %v1357_v20 }
 0x3b8   : > { %v1278_v42 = vadd.f32 %v1274_v63, %v1254_v45  ;;  %v1279_v43 = vadd.f32 %v1275_v9, %v1255_v28  ;;  %v1365_v20 = vsel %vm742_vm13, %v1361_v47, 0.0  ;;  %v1350_v27 = vmul.f32 %v2934_v62, %v1344_v32  ;;  %v2141_v47 = vld [vmem:[#allocation8] sm:$0xff] }
 0x3b9   : > { %v1364_v30 = vsel %vm741_vm8, %v1360_v21, 0.0  ;;  %v1371_v16 = vmul.f32 %v2995_v29, %v1365_v20  ;;  %v1406_v62 = vsel %vm795_vm7, %v1402_v1, 0.0 }
 0x3ba   : > { %v1298_v36 = vadd.f32 %v1296_v13, %v1278_v42  ;;  %v1299_v48 = vadd.f32 %v1297_v38, %v1279_v43  ;;  %v1370_v19 = vmul.f32 %v2995_v29, %v1364_v30  ;;  %v925_v29 = vsel %vm924_vm15, %v2999_v10, %v3001_v58 }
 0x3bb   : > { %v1412_v28 = vmul.f32 %v3007_v5, %v1406_v62  ;;  %v929_v58 = vsel %vm795_vm7, %v925_v29, 0.0 }
 0x3bc   : > { %v1318_v0 = vadd.f32 %v1316_v55, %v1298_v36  ;;  %v1319_v8 = vadd.f32 %v1317_v17, %v1299_v48 }
 0x3be   : > { %v1327_v53 = vadd.f32 %v1325_v60, %v1319_v8  ;;  %v1326_v2 = vadd.f32 %v1324_v37, %v1318_v0  ;;  %v1385_v14 = vpop.permute.xlu1 %1384 }
 0x3bf   : > { %v1390_v57 = vsel %vm911_vm0, %v1385_v14, %v3011_v24  ;;  %v917_v24 = vadd.f32 %v913_v35, %v894_v61 }
 0x3c0   : > { %v1353_v59 = vadd.f32 %v1351_v49, %v1327_v53  ;;  %v1352_v34 = vadd.f32 %v1350_v27, %v1326_v2 }
 0x3c2   : > { %v1372_v45 = vadd.f32 %v1370_v19, %v1352_v34  ;;  %v1373_v50 = vadd.f32 %v1371_v16, %v1353_v59 }
 0x3c4   : > { %v1394_v7 = vadd.f32 %v1390_v57, %v1372_v45  ;;  %v1395_v41 = vadd.f32 %v1391_v22, %v1373_v50 }
 0x3c6   : > { %v3103_v51 = vadd.f32 %v1412_v28, %v1394_v7  ;;  %v933_v10 = vpop.permute.xlu1 %932  ;;  %v3109_v44 = vadd.f32 %v1413_v26, %v1395_v41 }
 0x3c7   : > { %v935_v63 = vmul.f32 %v933_v10, %v929_v58  ;;  %v936_v9 = vmul.f32 %v933_v10, %v930_v56 }
 0x3c8   : > { %v1416_v5 = vadd.f32 %v3109_v44, %v3103_v51  ;;  %v1419_v39 = vmul.f32 %v3103_v51, %v3103_v51  ;;  %v1420_v13 = vmul.f32 %v3109_v44, %v3109_v44 }
 0x3c9   : > { %v3118_v4 = vadd.f32 %v935_v63, %v3021_v15  ;;  %v3120_v11 = vadd.f32 %v936_v9, %v917_v24  ;;  %v376_v15 = vld [vmem:[%s3200_s7] sm:$0xff] }
 0x3ca   : > { %1417 = vadd.xlane.f32.xlu0 %v1416_v5  ;;  %v1421_v33 = vadd.f32 %v1420_v13, %v1419_v39 }
 0x3cb   : > { %v939_v38 = vadd.f32 %v3120_v11, %v3118_v4  ;;  %v942_v42 = vmul.f32 %v3118_v4, %v3118_v4  ;;  %v943_v43 = vmul.f32 %v3120_v11, %v3120_v11 }
 0x3cc   : > { %1422 = vadd.xlane.f32.xlu1 %v1421_v33 }
 0x3cd   : > { %940 = vadd.xlane.f32.xlu2 %v939_v38  ;;  %v944_v54 = vadd.f32 %v943_v43, %v942_v42  ;;  %v375_v38 = vld [vmem:[#allocation9] sm:$0xff] }
 0x3d2   : > { %945 = vadd.xlane.f32.xlu0 %v944_v54 }
 0x3e5   : > { %981 = vperm.xlu1 %2128, %v2141_v47   ;;  %1457 = vperm.xlu2 %2127, %v2141_v47  }
 0x3e6   : > { %1463 = vperm.xlu0 %2129, %v2141_v47  }
 0x3ed   : > { %1490 = vperm.xlu1 %2128, %v376_v15   ;;  %2130 = vset.pattern.permute.xlu2 %v2352_v40 }
 0x3ee   : > { %987 = vperm.xlu2 %2130, %v2141_v47   ;;  %2131 = vset.pattern.permute.xlu0 %v2349_v31 }
 0x43d   : > { %v1418_v55 = vpop.xlane.xlu0 %1417 }
 0x43e   : > { %v1424_v17 = vrot.slane %v1418_v55, 4 }
 0x43f   : > { %v1423_v32 = vpop.xlane.xlu1 %1422 }
 0x440   : > { %v1425_v21 = vadd.f32 %v1424_v17, %v1418_v55  ;;  %v1431_v36 = vrot.slane %v1423_v32, 4  ;;  %v941_v48 = vpop.xlane.xlu2 %940  ;;  %v1494_v17 = vsel %vm784_vm9, %v375_v38, 0 }
 0x441   : > { %v947_v52 = vrot.slane %v941_v48, 4 }
 0x442   : > { %v1426_v12 = vrot.slane %v1425_v21, 2  ;;  %v1432_v18 = vadd.f32 %v1431_v36, %v1423_v32 }
 0x443   : > { %v948_v60 = vadd.f32 %v947_v52, %v941_v48  ;;  %v3138_v52 = vand.u32 4294901760, %v1494_v17 }
 0x444   : > { %v1427_v0 = vadd.f32 %v1426_v12, %v1425_v21  ;;  %v1433_v8 = vrot.slane %v1432_v18, 2 }
 0x445   : > { %v949_v37 = vrot.slane %v948_v60, 2  ;;  %v946_v49 = vpop.xlane.xlu0 %945 }
 0x446   : > { %v1428_v20 = vrot.slane %v1427_v0, 1  ;;  %v1434_v27 = vadd.f32 %v1433_v8, %v1432_v18  ;;  %v954_v40 = vrot.slane %v946_v49, 4 }
 0x447   : > { %v950_v30 = vadd.f32 %v949_v37, %v948_v60 }
 0x448   : > { %v1429_v1 = vadd.f32 %v1428_v20, %v1427_v0  ;;  %v1435_v31 = vrot.slane %v1434_v27, 1  ;;  %v955_v23 = vadd.f32 %v954_v40, %v946_v49  ;;  %v1458_v63 = vpop.permute.xlu2 %1457 }
 0x449   : > { %v951_v53 = vrot.slane %v950_v30, 1 }
 0x44a   : > { %v1430_v2 = vmul.f32 0.00048828125, %v1429_v1  ;;  %v1436_v14 = vadd.f32 %v1435_v31, %v1434_v27  ;;  %v956_v16 = vrot.slane %v955_v23, 2 }
 0x44b   : > { %v952_v19 = vadd.f32 %v951_v53, %v950_v30 }
 0x44c   : > { %v1437_v59 = vmul.f32 0.00048828125, %v1436_v14  ;;  %v1438_v34 = vmul.f32 %v1430_v2, %v1430_v2  ;;  %v957_v25 = vadd.f32 %v956_v16, %v955_v23  ;;  %v1441_v5 = vsub.f32 %v3103_v51, %v1430_v2 }
 0x44d   : > { %v953_v46 = vmul.f32 0.00048828125, %v952_v19  ;;  %v1442_v39 = vsub.f32 %v3109_v44, %v1430_v2 }
 0x44e   : > { %v1439_v62 = vsub.f32 %v1437_v59, %v1438_v34  ;;  %v958_v3 = vrot.slane %v957_v25, 1 }
 0x44f   : > { %v961_v29 = vmul.f32 %v953_v46, %v953_v46  ;;  %v964_v21 = vsub.f32 %v3118_v4, %v953_v46  ;;  %v965_v51 = vsub.f32 %v3120_v11, %v953_v46  ;;  %v3141_v4 = vsub.f32 %v1494_v17, %v3138_v52 }
 0x450   : > { %v1440_v45 = vmax.f32 %v1439_v62, 0.0  ;;  %v959_v6 = vadd.f32 %v958_v3, %v957_v25  ;;  %v988_v37 = vpop.permute.xlu2 %987 }
 0x451   : > { %v3144_v16 = vand.u32 4294901760, %v3141_v4 }
 0x452   : > { %v1443_v50 = vadd.f32 1e-05, %v1440_v45  ;;  %v960_v22 = vmul.f32 0.00048828125, %v959_v6 }
 0x453   : > { %v1517_v6 = vsub.f32 %v3141_v4, %v3144_v16 }
 0x454   : > { %2136 = vrsqrt.f32 %v1443_v50  ;;  %v962_v35 = vsub.f32 %v960_v22, %v961_v29  ;;  %vm1450_vm5 = vweird.f32 %v1443_v50 }
 0x456   : > { %v963_v57 = vmax.f32 %v962_v35, 0.0 }
 0x457   : > { %v982_v8 = vpop.permute.xlu1 %981 }
 0x458   : > { %v966_v28 = vadd.f32 1e-05, %v963_v57  ;;  %v1464_v47 = vpop.permute.xlu0 %1463 }
 0x45a   : > { %v2137_v26 = vpop.eup %2136  ;;  %2138 = vrsqrt.f32 %v966_v28  ;;  %vm973_vm8 = vweird.f32 %v966_v28 }
 0x45b   : > { %v1445_v7 = vmul.f32 %v2137_v26, %v1443_v50  ;;  %vm1451_vm4 = vweird.f32 %v2137_v26 }
 0x45c   : > { %vm1452_vm6 = vmor %vm1450_vm5, %vm1451_vm4 }
 0x45d   : > { %v1446_v41 = vmul.f32 %v2137_v26, %v1445_v7 }
 0x45f   : > { %v1447_v61 = vmul.f32 0.5, %v1446_v41  ;;  %v1518_v41 = vand.u32 4294901760, %v1517_v6 }
 0x460   : > { %v2139_v10 = vpop.eup %2138 }
 0x461   : > { %v968_v58 = vmul.f32 %v2139_v10, %v966_v28  ;;  %v1448_v56 = vsub.f32 1.5, %v1447_v61  ;;  %vm974_vm7 = vweird.f32 %v2139_v10 }
 0x462   : > { %vm975_vm10 = vmor %vm973_vm8, %vm974_vm7 }
 0x463   : > { %v969_v24 = vmul.f32 %v2139_v10, %v968_v58  ;;  %v1449_v9 = vmul.f32 %v2137_v26, %v1448_v56 }
 0x465   : > { %v970_v13 = vmul.f32 0.5, %v969_v24  ;;  %v1453_v33 = vsel %vm1452_vm6, %v2137_v26, %v1449_v9 }
 0x466   : > { %v1454_v42 = vmul.f32 %v1453_v33, %v1441_v5  ;;  %v1455_v43 = vmul.f32 %v1453_v33, %v1442_v39 }
 0x467   : > { %v971_v54 = vsub.f32 1.5, %v970_v13 }
 0x468   : > { %v1460_v15 = vmul.f32 %v1458_v63, %v1454_v42  ;;  %v1461_v55 = vmul.f32 %v1458_v63, %v1455_v43 }
 0x469   : > { %v972_v32 = vmul.f32 %v2139_v10, %v971_v54 }
 0x46a   : > { %v1466_v44 = vadd.f32 %v1464_v47, %v1460_v15  ;;  %v1467_v36 = vadd.f32 %v1464_v47, %v1461_v55  ;;  %v1491_v47 = vpop.permute.xlu1 %1490 }
 0x46b   : > { %v976_v48 = vsel %vm975_vm10, %v2139_v10, %v972_v32 }
 0x46c   : > { %v977_v12 = vmul.f32 %v976_v48, %v964_v21  ;;  %v978_v18 = vmul.f32 %v976_v48, %v965_v51  ;;  %v1470_v60 = vadd.f32 3.0, %v1466_v44  ;;  %v1471_v0 = vadd.f32 3.0, %v1467_v36 }
 0x46e   : > { %v984_v49 = vmul.f32 %v982_v8, %v977_v12  ;;  %v985_v20 = vmul.f32 %v982_v8, %v978_v18  ;;  %v1474_v27 = vmax.f32 %v1470_v60, 0.0  ;;  %v1475_v40 = vmax.f32 %v1471_v0, 0.0 }
 0x470   : > { %v1478_v11 = vmin.f32 %v1474_v27, 6.0  ;;  %v1479_v30 = vmin.f32 %v1475_v40, 6.0  ;;  %v990_v1 = vadd.f32 %v988_v37, %v984_v49  ;;  %v991_v31 = vadd.f32 %v988_v37, %v985_v20 }
 0x472   : > { %v1482_v23 = vmul.f32 %v1478_v11, %v1466_v44  ;;  %v1483_v53 = vmul.f32 %v1479_v30, %v1467_v36  ;;  %v1468_v2 = vadd.f32 3.0, %v990_v1  ;;  %v1469_v14 = vadd.f32 3.0, %v991_v31 }
 0x474   : > { %v1486_v19 = vmul.f32 0.16666667, %v1482_v23  ;;  %v1487_v59 = vmul.f32 0.16666667, %v1483_v53  ;;  %v1472_v34 = vmax.f32 %v1468_v2, 0.0  ;;  %v1473_v25 = vmax.f32 %v1469_v14, 0.0 }
 0x476   : > { %v1510_v62 = vand.u32 4294901760, %v1486_v19  ;;  %v1669_v46 = vand.u32 4294901760, %v1487_v59  ;;  %v1476_v3 = vmin.f32 %v1472_v34, 6.0  ;;  %v1477_v45 = vmin.f32 %v1473_v25, 6.0 }
 0x478   : > { %v1538_v50 = vsub.f32 %v1486_v19, %v1510_v62  ;;  %v1697_v29 = vsub.f32 %v1487_v59, %v1669_v46  ;;  %v1480_v22 = vmul.f32 %v1476_v3, %v990_v1  ;;  %v1481_v35 = vmul.f32 %v1477_v45, %v991_v31  ;;  %1511 = vmatpush.msrb.mxu0 %v1510_v62 }
 0x479   : > { %1595 = vmatpush.msrb.mxu3 %v1510_v62 }
 0x47a   : > { %v1698_v57 = vand.u32 4294901760, %v1697_v29  ;;  %v1484_v28 = vmul.f32 0.16666667, %v1480_v22  ;;  %v1485_v26 = vmul.f32 0.16666667, %v1481_v35  ;;  %1570 = vmatpush.msrb.mxu2 %v1538_v50  ;;  %v1539_v7 = vand.u32 4294901760, %v1538_v50 }
 0x47c   : > { %v1512_v61 = vand.u32 4294901760, %v1484_v28  ;;  %v1671_v10 = vand.u32 4294901760, %v1485_v26  ;;  %v1540_v58 = vsub.f32 %v1538_v50, %v1539_v7  ;;  %v1699_v56 = vsub.f32 %v1697_v29, %v1698_v57 }
 0x47e   : > { %1513 = vmatpush.msrb.mxu0 %v1512_v61  ;;  %1597 = vmatpush.msrb.mxu3 %v1512_v61  ;;  %v1541_v24 = vand.u32 4294901760, %v1540_v58  ;;  %v1544_v63 = vsub.f32 %v1484_v28, %v1512_v61  ;;  %v1700_v9 = vand.u32 4294901760, %v1699_v56  ;;  %v1703_v5 = vsub.f32 %v1485_v26, %v1671_v10 }
 0x47f   : > { %1519 = vmatmul.f32.vlgmr.msrb.gmra.mxu0 %v1518_v41  ;;  %1601 = vmatmul.f32.vlgmr.msrb.gmra.mxu3 %v3144_v16 }
 0x480   : > { %1622 = vmatpush.msra.mxu0 %v1539_v7  ;;  %1542 = vmatpush.msrb.mxu1 %v1541_v24  ;;  %v1545_v39 = vand.u32 4294901760, %v1544_v63  ;;  %v1704_v13 = vand.u32 4294901760, %v1703_v5 }
 0x481   : > { %1573 = vmatpush.msrb.mxu2 %v1544_v63  ;;  %1701 = vmatpush.msra.mxu3 %v1700_v9 }
 0x482   : > { %1576 = vmatmul.f32.vlgmr.msrb.gmra.mxu2 %v3141_v4  ;;  %1626 = vmatpush.msra.mxu0 %v1545_v39  ;;  %v1546_v33 = vsub.f32 %v1544_v63, %v1545_v39  ;;  %v1705_v38 = vsub.f32 %v1703_v5, %v1704_v13 }
 0x483   : > { %1670 = vmatpush.msra.mxu2 %v1669_v46 }
 0x484   : > { %1729 = vmatpush.msrb.mxu0 %v1697_v29  ;;  %v1547_v42 = vand.u32 4294901760, %v1546_v33  ;;  %v1706_v43 = vand.u32 4294901760, %v1705_v38 }
 0x485   : > { %1672 = vmatpush.msra.mxu2 %v1671_v10 }
 0x486   : > { %1732 = vmatpush.msrb.mxu0 %v1703_v5  ;;  %1548 = vmatpush.msrb.mxu1 %v1547_v42 }
 0x487   : > { %1781 = vmatpush.msrb.mxu2 %v1698_v57  ;;  %1707 = vmatpush.msra.mxu3 %v1706_v43 }
 0x488   : > { %1550 = vmatmul.f32.vlgmr.msrb.gmra.mxu1 %v3138_v52  ;;  %1628 = vmatmul.f32.vlgmr.msra.gmra.mxu0 %v3138_v52 }
 0x489   : > { %1785 = vmatpush.msrb.mxu2 %v1704_v13  ;;  %1647 = vmatpush.msra.mxu1 %v1510_v62 }
 0x48a   : > { %1806 = vmatpush.msrb.mxu3 %v1669_v46  ;;  %1678 = vmatmul.f32.vlgmr.msra.gmra.mxu2 %v1518_v41 }
 0x48b   : > { %1649 = vmatpush.msra.mxu1 %v1512_v61  ;;  %1709 = vmatmul.f32.vlgmr.msra.gmra.mxu3 %v3138_v52 }
 0x48c   : > { %1808 = vmatpush.msrb.mxu3 %v1671_v10 }
 0x48d   : > { %1754 = vmatpush.msrb.mxu1 %v1669_v46 }
 0x48f   : > { %1756 = vmatpush.msrb.mxu1 %v1671_v10 }
 0x490   : > { %1651 = vmatmul.f32.vlgmr.msra.gmra.mxu1 %v3138_v52  ;;  %1735 = vmatmul.f32.vlgmr.msrb.gmra.mxu0 %v3141_v4 }
 0x492   : > { %1787 = vmatmul.f32.vlgmr.msrb.gmra.mxu2 %v3138_v52 }
 0x493   : > { %1810 = vmatmul.f32.vlgmr.msrb.gmra.mxu3 %v3138_v52 }
 0x498   : > { %1760 = vmatmul.f32.vlgmr.msrb.gmra.mxu1 %v3144_v16 }
 0x4fc   : > { %v1520_v54 = vpop.f32.mrf.mxu0 }
 0x4fd   : > { %v1521_v15 = vadd.f32 %v1520_v54, %v1491_v47 }
 0x502   : > { %v1602_v21 = vpop.f32.mrf.mxu3 }
 0x505   : > { %v1551_v55 = vpop.f32.mrf.mxu1  ;;  %v1577_v32 = vpop.f32.mrf.mxu2 }
 0x506   : > { %v1552_v17 = vadd.f32 %v1551_v55, %v1521_v15  ;;  %v1629_v51 = vpop.f32.mrf.mxu0 }
 0x508   : > { %v1578_v44 = vadd.f32 %v1577_v32, %v1552_v17 }
 0x50a   : > { %v1603_v36 = vadd.f32 %v1602_v21, %v1578_v44 }
 0x50c   : > { %v1630_v48 = vadd.f32 %v1629_v51, %v1603_v36 }
 0x50d   : > { %v1652_v12 = vpop.f32.mrf.mxu1  ;;  %v1679_v60 = vpop.f32.mrf.mxu2 }
 0x50e   : > { %v1653_v18 = vadd.f32 %v1652_v12, %v1630_v48  ;;  %v1680_v0 = vadd.f32 %v1679_v60, %v1491_v47  ;;  %v1710_v52 = vpop.f32.mrf.mxu3  ;;  %v1736_v37 = vpop.f32.mrf.mxu0 }
 0x510   : > { %1814 = vst [vmem:[%s367_s17] sm:$0xff] %v1653_v18  ;;  %v1711_v8 = vadd.f32 %v1710_v52, %v1680_v0 }
 0x512   : > { %v1737_v49 = vadd.f32 %v1736_v37, %v1711_v8 }
 0x515   : > { %v1761_v20 = vpop.f32.mrf.mxu1  ;;  %v1788_v40 = vpop.f32.mrf.mxu2 }
 0x516   : > { %v1762_v27 = vadd.f32 %v1761_v20, %v1737_v49  ;;  %v1811_v11 = vpop.f32.mrf.mxu3 }
 0x518   : > { %v1789_v4 = vadd.f32 %v1788_v40, %v1762_v27 }
 0x51a   : > { %v1812_v30 = vadd.f32 %v1811_v11, %v1789_v4 }
 0x51c   : > { %1815 = vst [vmem:[%s367_s17 + $0x8] sm:$0xff] %v1812_v30 }
 0x51d   : > { %2289 = shalt.err (!%p2286_p11)
}
 0x51e   : > { %1968 = dma.vmem_to_hbm [thread:$0]  (%p2494_p3), %s1831_s24, 256, %s1833_s21, %s1817_s10  }
 0x51f PF: > { %s1844_s18 = sand.u32 1, %s2324_s27   ;;  %p3211_p12 = scmp.ge.s32.totalorder %s2336_s30, 2 }
 0x520   : > { %s1845_s17 = scalar_lea.sflag [#allocation5], %s1844_s18 }
 0x521   : > { %p1985_p13 = pnand %p3211_p12, %p2457_p6 }
 0x523   : > { %p1986_p0 = pneg %p1985_p13 }
 0x525   : > { %2319 = dma.done.wait (%p1986_p0), %s1845_s17, 256  }
 0x526   : > { %2321 = vsyncadd (%p1986_p0), %s1845_s17, 4294967040  ;;  %p23_p5 = scmp.ge.s32.totalorder %s2481_s14, 4   ;;  %s3212_s27 = smov %s2328_s28 }
 0x527   : > { %s3213_s28 = smov %s2332_s29  ;;  %s3214_s29 = smov %s2490_s20 }
 0x528   : > { %s3215_s30 = smov %s2481_s14  ;;  %25 = sbr.rel (!%p23_p5) target bundleno = 10 (0xa), region = 109 }
 0x52d   :  { %1851 = vsyncpa [#allocation4], 1 }
 0x52e   :  { %1853 = vsyncpa [#allocation4 + $0x1], 1 }
 0x52f   :  { %1854 = vsyncpa [#allocation7], 1 }
 0x530   :  { %1855 = vsyncpa [#allocation10], 1 }
 0x531   :  { %1856 = vsyncpa [#allocation5], 1 }
 0x532   :  { %1858 = vsyncpa [#allocation5 + $0x1], 1 }

</bundles_post_ra>
